<compile_context>
chip_gen: v5e
topology: v5e:2x2
jax: 0.10.0
libtpu: 0.0.40
codegen_flags: <defaults>
</compile_context>

<pallas_src>
import functools

import jax
import jax.numpy as jnp
from jax import lax
from jax.experimental import pallas as pl
from jax.experimental.pallas import tpu as pltpu


def _round_up(x, m):
    return (x + m - 1) // m * m


_NSLOT = 4  # 3 live temporal taps + 1 prefetch-in-flight


def _peg_kernel(x_hbm, w_ref, b_ref, o_ref, buf_ref, sem_ref, *,
                pad_front, H, W, SH, n_strips, unroll):
    # x_hbm  : (B, T, H, W, Dp) full input, left in HBM (pl.ANY)
    # w_ref  : (3, 9, Dp) depthwise weights [kt, kh*3 + kw, ch] in VMEM
    # b_ref  : (1, Dp)    bias (f32) in VMEM
    # o_ref  : (H, W, Dp) one output frame
    # buf_ref: (_NSLOT, H+2, W+2, Dp) spatially padded frame ring (VMEM)
    # sem_ref: (_NSLOT,) DMA semaphores
    b = pl.program_id(0)
    t = pl.program_id(1)
    T = pl.num_programs(1)
    Dp = o_ref.shape[-1]

    def clamp_t(src):
        return jnp.clip(src, 0, T - 1)

    def frame_copy(slot, src_t):
        # One (H, W, Dp) frame HBM -> interior of a zero-halo'd ring slot.
        return pltpu.make_async_copy(
            x_hbm.at[b, src_t],
            buf_ref.at[slot, pl.ds(1, H), pl.ds(1, W), :],
            sem_ref.at[slot])

    # ------------- DMA schedule: single-fetch ring + one-ahead prefetch ------
    @pl.when(t == 0)
    def _():
        # Zero the ring once per batch element; DMAs only ever write the
        # interior, so the spatial halo (and padded channels) stays zero.
        buf_ref[...] = jnp.zeros(buf_ref.shape, buf_ref.dtype)
        for kt in range(3):                       # prime taps 0..2 of frame 0
            frame_copy(kt, clamp_t(kt - pad_front)).start()

    @pl.when(t + 1 < T)
    def _():
        # Prefetch the single new frame needed at step t+1 (slot (t+3)%4 is
        # not read by this step's compute) -> DMA overlaps compute.
        frame_copy((t + 3) % _NSLOT, clamp_t(t + 3 - pad_front)).start()

    @pl.when(t == 0)
    def _():
        for kt in range(3):
            frame_copy(kt, 0).wait()

    @pl.when(t > 0)
    def _():
        frame_copy((t + 2) % _NSLOT, 0).wait()

    # ------------- hoisted per-step prep (outside the strip loop) ------------
    # Fused temporal zero padding: gate each kt tap's weights when its source
    # frame falls outside [0, T) (clamped boundary DMAs hold real data, so the
    # zero gate never multiplies uninitialized VMEM).
    w_all = w_ref[...]                                           # (3, 9, Dp)
    w_rows = []
    for kt in range(3):
        src = t + kt - pad_front
        valid = jnp.logical_and(src >= 0, src < T)
        wk = jnp.where(valid, w_all[kt], jnp.zeros_like(w_all[kt]))
        for tap in range(9):
            w_rows.append(wk[tap])                               # (Dp,)
    bias_plane = jnp.broadcast_to(b_ref[0].astype(jnp.float32), (SH, W, Dp))

    # ------------- strip-tiled accumulation ----------------------------------
    def strip_body(s, carry):
        # Clamp so a ragged last strip overlaps the previous one (identical
        # values recomputed) instead of running past H.
        row = jnp.minimum(s * SH, H - SH)
        acc = bias_plane
        for kt in range(3):
            slot = (t + kt) % _NSLOT
            for kh in range(3):
                xs = buf_ref[slot, pl.ds(row + kh, SH)]          # (SH, W+2, Dp)
                for kw in range(3):
                    # Static value-level slice: the kw shift happens on vregs,
                    # not as an unaligned sublane load from VMEM.
                    patch = xs[:, kw:kw + W, :]
                    prod = patch * w_rows[kt * 9 + kh * 3 + kw]
                    acc = acc + prod.astype(jnp.float32)
        o_ref[pl.ds(row, SH)] = acc.astype(o_ref.dtype)
        return carry

    lax.fori_loop(0, n_strips, strip_body, 0, unroll=unroll)


def peg_depthwise_conv3d(x_bthwd, weight_pt, bias, causal=False):
    """Depthwise 3x3x3 conv with PEG's padding. x_bthwd: (B, T, H, W, D)."""
    B, T, H, W, D = x_bthwd.shape
    pad_front = 2 if causal else 1

    # Lane-dense channel axis: pad D to a multiple of 128 (a no-op for real
    # model widths). Spatial + temporal zero padding is fused in the kernel,
    # so this is the only wrapper-side pad.
    Dp = _round_up(D, 128)
    x_in = x_bthwd if Dp == D else jnp.pad(
        x_bthwd, ((0, 0), (0, 0), (0, 0), (0, 0), (0, Dp - D)))

    # PyTorch Conv3d(dim, dim, 3, groups=dim) weight: (D, 1, 3, 3, 3)
    # -> (3, 9, Dp) laid out [kt, kh*3 + kw, channel]. Multiplies run in the
    # activation dtype (bf16 stays bf16 on v6e/v7x); accumulation is f32.
    w_flat = jnp.transpose(weight_pt[:, 0].reshape(D, 27))                # (27, D)
    w_flat = jnp.pad(w_flat, ((0, 0), (0, Dp - D))).reshape(3, 9, Dp)
    w_flat = w_flat.astype(x_bthwd.dtype)
    b2 = jnp.pad(bias.astype(jnp.float32), (0, Dp - D)).reshape(1, Dp)

    Hp, Wp = H + 2, W + 2
    SH = min(8, H)                        # H-strip height for the inner loop
    n_strips = -(-H // SH)

    # VMEM budget from actual slab sizes (2x headroom), clamped to a value
    # every current chip can provide (v7x has only 64 MiB physical VMEM).
    item = x_in.dtype.itemsize
    ring_bytes = _NSLOT * Hp * Wp * Dp * item
    out_bytes = 2 * H * W * Dp * item            # double-buffered output block
    w_bytes = 2 * (3 * 9 * Dp * item + Dp * 4)
    strip_bytes = 8 * SH * Wp * Dp * 4           # strip-sized f32 temporaries
    vmem_limit = int(2 * (ring_bytes + out_bytes + w_bytes + strip_bytes))
    vmem_limit = min(max(vmem_limit, 16 * 1024 * 1024), 64 * 1024 * 1024)

    kernel = functools.partial(
        _peg_kernel, pad_front=pad_front, H=H, W=W, SH=SH,
        n_strips=n_strips, unroll=(n_strips <= 8))

    out = pl.pallas_call(
        kernel,
        out_shape=jax.ShapeDtypeStruct((B, T, H, W, Dp), x_in.dtype),
        grid_spec=pltpu.PrefetchScalarGridSpec(
            num_scalar_prefetch=0,
            grid=(B, T),
            in_specs=[
                pl.BlockSpec(memory_space=pl.ANY),          # whole volume, HBM
                pl.BlockSpec((3, 9, Dp), lambda b, t: (0, 0, 0)),
                pl.BlockSpec((1, Dp), lambda b, t: (0, 0)),
            ],
            out_specs=pl.BlockSpec(
                (pl.Squeezed(), pl.Squeezed(), H, W, Dp),
                lambda b, t: (b, t, 0, 0, 0)),
            scratch_shapes=[
                pltpu.VMEM((_NSLOT, Hp, Wp, Dp), x_in.dtype),
                pltpu.SemaphoreType.DMA((_NSLOT,)),
            ]),
        compiler_params=pltpu.CompilerParams(
            dimension_semantics=("parallel", "arbitrary"),
            vmem_limit_bytes=vmem_limit),
    )(x_in, w_flat, b2)

    if Dp != D:
        out = out[..., :D]
    return out


def peg_forward(x, weight, bias, causal=False, shape=None):
    """Mirrors PEG.forward. x: (b, t, h, w, d) or (b, n, d) with shape=(b,t,h,w)."""
    needs_shape = x.ndim == 3
    assert not (needs_shape and shape is None)
    orig_shape = x.shape
    if needs_shape:
        x = x.reshape(*shape, -1)
    out = peg_depthwise_conv3d(x, weight, bias, causal=causal)
    return out.reshape(orig_shape)


if __name__ == "__main__":
    key = jax.random.PRNGKey(0)
    B, T, H, W, D = 2, 4, 6, 6, 16
    kx, kw_, kb = jax.random.split(key, 3)

    x = jax.random.normal(kx, (B, T, H, W, D), dtype=jnp.float32)

    # Conv3d(dim, dim, 3, groups=dim): weight (dim, 1, 3, 3, 3), bias (dim,)
    fan_in = 1 * 3 * 3 * 3
    bound = 1.0 / (fan_in ** 0.5)
    weight = jax.random.uniform(kw_, (D, 1, 3, 3, 3), jnp.float32, -bound, bound)
    bias = jax.random.uniform(kb, (D,), jnp.float32, -bound, bound)

    def xla_ref(x5, frame_pad):
        xp = jnp.pad(x5, ((0, 0), frame_pad, (1, 1), (1, 1), (0, 0)))
        x_ncdhw = jnp.transpose(xp, (0, 4, 1, 2, 3))
        ref = lax.conv_general_dilated(
            x_ncdhw, weight, window_strides=(1, 1, 1), padding="VALID",
            dimension_numbers=("NCDHW", "OIDHW", "NCDHW"),
            feature_group_count=D)
        return jnp.transpose(ref, (0, 2, 3, 4, 1)) + bias

    # 5-D input path (non-causal frame padding (1,1))
    out = jax.block_until_ready(peg_forward(x, weight, bias, causal=False))
    assert out.shape == x.shape
    ref = xla_ref(x, (1, 1))
    assert jnp.allclose(out, ref, atol=1e-4, rtol=1e-4), "non-causal mismatch"

    # (b, n, d) + shape path (causal frame padding (2,0)), output reshaped back.
    x_flat = x.reshape(B, T * H * W, D)
    out3 = jax.block_until_ready(
        peg_forward(x_flat, weight, bias, causal=True, shape=(B, T, H, W)))
    assert out3.shape == x_flat.shape
    ref_c = xla_ref(x, (2, 0)).reshape(B, T * H * W, D)
    assert jnp.allclose(out3, ref_c, atol=1e-4, rtol=1e-4), "causal mismatch"

    print("KERNEL_OK")
</pallas_src>

<mosaic_0001>
module attributes {stable_mosaic.version = 11 : i64} {
  func.func @_peg_kernel(%arg0: i32, %arg1: i32, %arg2: memref<2x4x6x6x128xf32, #tpu.memory_space<any>>, %arg3: memref<3x9x128xf32, #tpu.memory_space<vmem>>, %arg4: memref<1x128xf32, #tpu.memory_space<vmem>>, %arg5: memref<1x1x6x6x128xf32, #tpu.memory_space<vmem>>, %arg6: memref<4x8x8x128xf32, #tpu.memory_space<vmem>>, %arg7: memref<4x!tpu.dma_semaphore, #tpu.memory_space<semaphore_mem>>) attributes {dimension_semantics = [#tpu.dimension_semantics<parallel>, #tpu.dimension_semantics<arbitrary>], iteration_bounds = array<i64: 2, 4>, scalar_prefetch = 0 : i64, scratch_operands = 2 : i64, tpu.core_type = #tpu.core_type<tc>, window_params = [{}, {pipeline_mode = #tpu.pipeline_mode<synchronous>, transform_indices = @transform_1, window_bounds = array<i64: 3, 9, 128>}, {pipeline_mode = #tpu.pipeline_mode<synchronous>, transform_indices = @transform_2, window_bounds = array<i64: 1, 128>}, {transform_indices = @transform_3, window_bounds = array<i64: 1, 1, 6, 6, 128>}]} {
    %c0_i32 = arith.constant 0 : i32
    %0 = arith.cmpi eq, %arg1, %c0_i32 : i32
    %1 = arith.extui %0 : i1 to i32
    %c0_i32_0 = arith.constant 0 : i32
    %2 = arith.cmpi ne, %1, %c0_i32_0 : i32
    scf.if %2 {
      %cst_78 = arith.constant 0.000000e+00 : f32
      %318 = vector.broadcast %cst_78 : f32 to vector<4x8x8x128xf32>
      %c0_79 = arith.constant 0 : index
      %c0_80 = arith.constant 0 : index
      %c0_81 = arith.constant 0 : index
      %c0_82 = arith.constant 0 : index
      %319 = vector.load %arg6[%c0_79, %c0_80, %c0_81, %c0_82] : memref<4x8x8x128xf32, #tpu.memory_space<vmem>>, vector<4x8x8x128xf32>
      tpu.vector_store %arg6[%c0_79, %c0_80, %c0_81, %c0_82], %318 {strides = array<i32>} : memref<4x8x8x128xf32, #tpu.memory_space<vmem>>, vector<4x8x8x128xf32>,
      %c-1_i32 = arith.constant -1 : i32
      %c0_i32_83 = arith.constant 0 : i32
      %c3_i32 = arith.constant 3 : i32
      %320 = arith.maxsi %c0_i32_83, %c-1_i32 : i32
      %321 = arith.minsi %c3_i32, %320 : i32
      %c0_i32_84 = arith.constant 0 : i32
      %c0_i32_85 = arith.constant 0 : i32
      %c0_i32_86 = arith.constant 0 : i32
      %c0_i32_87 = arith.constant 0 : i32
      %c0_i32_88 = arith.constant 0 : i32
      %322 = tpu.memref_slice %arg2[%arg0, %321, %c0_i32_86, %c0_i32_87, %c0_i32_88] : memref<2x4x6x6x128xf32, #tpu.memory_space<any>> -> memref<1x1x6x6x128xf32, #tpu.memory_space<any>>
      %323 = tpu.memref_squeeze %322 : memref<1x1x6x6x128xf32, #tpu.memory_space<any>> -> memref<6x6x128xf32, #tpu.memory_space<any>>
      %c1_i32_89 = arith.constant 1 : i32
      %c1_i32_90 = arith.constant 1 : i32
      %c0_i32_91 = arith.constant 0 : i32
      %324 = tpu.memref_slice %arg6[%c0_i32_84, %c1_i32_89, %c1_i32_90, %c0_i32_91] : memref<4x8x8x128xf32, #tpu.memory_space<vmem>> -> memref<1x6x6x128xf32, #tpu.memory_space<vmem>>
      %325 = tpu.memref_squeeze %324 : memref<1x6x6x128xf32, #tpu.memory_space<vmem>> -> memref<6x6x128xf32, #tpu.memory_space<vmem>>
      %326 = tpu.memref_slice %arg7[%c0_i32_85] : memref<4x!tpu.dma_semaphore, #tpu.memory_space<semaphore_mem>> -> memref<1x!tpu.dma_semaphore, #tpu.memory_space<semaphore_mem>>
      %327 = tpu.memref_squeeze %326 : memref<1x!tpu.dma_semaphore, #tpu.memory_space<semaphore_mem>> -> memref<!tpu.dma_semaphore, #tpu.memory_space<semaphore_mem>>
      tpu.enqueue_dma source(%323 : memref<6x6x128xf32, #tpu.memory_space<any>>) target(%325 : memref<6x6x128xf32, #tpu.memory_space<vmem>>) target_semaphore(%327 : memref<!tpu.dma_semaphore, #tpu.memory_space<semaphore_mem>>)
      %c0_i32_92 = arith.constant 0 : i32
      %c0_i32_93 = arith.constant 0 : i32
      %c3_i32_94 = arith.constant 3 : i32
      %328 = arith.maxsi %c0_i32_93, %c0_i32_92 : i32
      %329 = arith.minsi %c3_i32_94, %328 : i32
      %c1_i32_95 = arith.constant 1 : i32
      %c1_i32_96 = arith.constant 1 : i32
      %c0_i32_97 = arith.constant 0 : i32
      %c0_i32_98 = arith.constant 0 : i32
      %c0_i32_99 = arith.constant 0 : i32
      %330 = tpu.memref_slice %arg2[%arg0, %329, %c0_i32_97, %c0_i32_98, %c0_i32_99] : memref<2x4x6x6x128xf32, #tpu.memory_space<any>> -> memref<1x1x6x6x128xf32, #tpu.memory_space<any>>
      %331 = tpu.memref_squeeze %330 : memref<1x1x6x6x128xf32, #tpu.memory_space<any>> -> memref<6x6x128xf32, #tpu.memory_space<any>>
      %c1_i32_100 = arith.constant 1 : i32
      %c1_i32_101 = arith.constant 1 : i32
      %c0_i32_102 = arith.constant 0 : i32
      %332 = tpu.memref_slice %arg6[%c1_i32_95, %c1_i32_100, %c1_i32_101, %c0_i32_102] : memref<4x8x8x128xf32, #tpu.memory_space<vmem>> -> memref<1x6x6x128xf32, #tpu.memory_space<vmem>>
      %333 = tpu.memref_squeeze %332 : memref<1x6x6x128xf32, #tpu.memory_space<vmem>> -> memref<6x6x128xf32, #tpu.memory_space<vmem>>
      %334 = tpu.memref_slice %arg7[%c1_i32_96] : memref<4x!tpu.dma_semaphore, #tpu.memory_space<semaphore_mem>> -> memref<1x!tpu.dma_semaphore, #tpu.memory_space<semaphore_mem>>
      %335 = tpu.memref_squeeze %334 : memref<1x!tpu.dma_semaphore, #tpu.memory_space<semaphore_mem>> -> memref<!tpu.dma_semaphore, #tpu.memory_space<semaphore_mem>>
      tpu.enqueue_dma source(%331 : memref<6x6x128xf32, #tpu.memory_space<any>>) target(%333 : memref<6x6x128xf32, #tpu.memory_space<vmem>>) target_semaphore(%335 : memref<!tpu.dma_semaphore, #tpu.memory_space<semaphore_mem>>)
      %c1_i32_103 = arith.constant 1 : i32
      %c0_i32_104 = arith.constant 0 : i32
      %c3_i32_105 = arith.constant 3 : i32
      %336 = arith.maxsi %c0_i32_104, %c1_i32_103 : i32
      %337 = arith.minsi %c3_i32_105, %336 : i32
      %c2_i32_106 = arith.constant 2 : i32
      %c2_i32_107 = arith.constant 2 : i32
      %c0_i32_108 = arith.constant 0 : i32
      %c0_i32_109 = arith.constant 0 : i32
      %c0_i32_110 = arith.constant 0 : i32
      %338 = tpu.memref_slice %arg2[%arg0, %337, %c0_i32_108, %c0_i32_109, %c0_i32_110] : memref<2x4x6x6x128xf32, #tpu.memory_space<any>> -> memref<1x1x6x6x128xf32, #tpu.memory_space<any>>
      %339 = tpu.memref_squeeze %338 : memref<1x1x6x6x128xf32, #tpu.memory_space<any>> -> memref<6x6x128xf32, #tpu.memory_space<any>>
      %c1_i32_111 = arith.constant 1 : i32
      %c1_i32_112 = arith.constant 1 : i32
      %c0_i32_113 = arith.constant 0 : i32
      %340 = tpu.memref_slice %arg6[%c2_i32_106, %c1_i32_111, %c1_i32_112, %c0_i32_113] : memref<4x8x8x128xf32, #tpu.memory_space<vmem>> -> memref<1x6x6x128xf32, #tpu.memory_space<vmem>>
      %341 = tpu.memref_squeeze %340 : memref<1x6x6x128xf32, #tpu.memory_space<vmem>> -> memref<6x6x128xf32, #tpu.memory_space<vmem>>
      %342 = tpu.memref_slice %arg7[%c2_i32_107] : memref<4x!tpu.dma_semaphore, #tpu.memory_space<semaphore_mem>> -> memref<1x!tpu.dma_semaphore, #tpu.memory_space<semaphore_mem>>
      %343 = tpu.memref_squeeze %342 : memref<1x!tpu.dma_semaphore, #tpu.memory_space<semaphore_mem>> -> memref<!tpu.dma_semaphore, #tpu.memory_space<semaphore_mem>>
      tpu.enqueue_dma source(%339 : memref<6x6x128xf32, #tpu.memory_space<any>>) target(%341 : memref<6x6x128xf32, #tpu.memory_space<vmem>>) target_semaphore(%343 : memref<!tpu.dma_semaphore, #tpu.memory_space<semaphore_mem>>)
    } else {
    }
    %c1_i32 = arith.constant 1 : i32
    %3 = arith.addi %arg1, %c1_i32 : i32
    %c4_i32 = arith.constant 4 : i32
    %4 = arith.cmpi slt, %3, %c4_i32 : i32
    %5 = arith.extui %4 : i1 to i32
    %c0_i32_1 = arith.constant 0 : i32
    %6 = arith.cmpi ne, %5, %c0_i32_1 : i32
    scf.if %6 {
      %c3_i32 = arith.constant 3 : i32
      %318 = arith.addi %arg1, %c3_i32 : i32
      %c4_i32_78 = arith.constant 4 : i32
      %c0_i32_79 = arith.constant 0 : i32
      %319 = arith.cmpi eq, %c4_i32_78, %c0_i32_79 : i32
      %c1_i32_80 = arith.constant 1 : i32
      %320 = arith.select %319, %c1_i32_80, %c4_i32_78 : i32
      %321 = arith.remsi %318, %320 : i32
      %c0_i32_81 = arith.constant 0 : i32
      %322 = arith.cmpi ne, %321, %c0_i32_81 : i32
      %c0_i32_82 = arith.constant 0 : i32
      %323 = arith.cmpi slt, %321, %c0_i32_82 : i32
      %c0_i32_83 = arith.constant 0 : i32
      %324 = arith.cmpi slt, %320, %c0_i32_83 : i32
      %325 = arith.xori %323, %324 : i1
      %326 = arith.andi %325, %322 : i1
      %327 = arith.addi %321, %320 : i32
      %328 = arith.select %326, %327, %321 : i32
      %c3_i32_84 = arith.constant 3 : i32
      %329 = arith.addi %arg1, %c3_i32_84 : i32
      %c1_i32_85 = arith.constant 1 : i32
      %330 = arith.subi %329, %c1_i32_85 : i32
      %c0_i32_86 = arith.constant 0 : i32
      %c3_i32_87 = arith.constant 3 : i32
      %331 = arith.maxsi %c0_i32_86, %330 : i32
      %332 = arith.minsi %c3_i32_87, %331 : i32
      %c0_i32_88 = arith.constant 0 : i32
      %c0_i32_89 = arith.constant 0 : i32
      %c0_i32_90 = arith.constant 0 : i32
      %333 = tpu.memref_slice %arg2[%arg0, %332, %c0_i32_88, %c0_i32_89, %c0_i32_90] : memref<2x4x6x6x128xf32, #tpu.memory_space<any>> -> memref<1x1x6x6x128xf32, #tpu.memory_space<any>>
      %334 = tpu.memref_squeeze %333 : memref<1x1x6x6x128xf32, #tpu.memory_space<any>> -> memref<6x6x128xf32, #tpu.memory_space<any>>
      %c1_i32_91 = arith.constant 1 : i32
      %c1_i32_92 = arith.constant 1 : i32
      %c0_i32_93 = arith.constant 0 : i32
      %335 = tpu.memref_slice %arg6[%328, %c1_i32_91, %c1_i32_92, %c0_i32_93] : memref<4x8x8x128xf32, #tpu.memory_space<vmem>> -> memref<1x6x6x128xf32, #tpu.memory_space<vmem>>
      %336 = tpu.memref_squeeze %335 : memref<1x6x6x128xf32, #tpu.memory_space<vmem>> -> memref<6x6x128xf32, #tpu.memory_space<vmem>>
      %337 = tpu.memref_slice %arg7[%328] : memref<4x!tpu.dma_semaphore, #tpu.memory_space<semaphore_mem>> -> memref<1x!tpu.dma_semaphore, #tpu.memory_space<semaphore_mem>>
      %338 = tpu.memref_squeeze %337 : memref<1x!tpu.dma_semaphore, #tpu.memory_space<semaphore_mem>> -> memref<!tpu.dma_semaphore, #tpu.memory_space<semaphore_mem>>
      tpu.enqueue_dma source(%334 : memref<6x6x128xf32, #tpu.memory_space<any>>) target(%336 : memref<6x6x128xf32, #tpu.memory_space<vmem>>) target_semaphore(%338 : memref<!tpu.dma_semaphore, #tpu.memory_space<semaphore_mem>>)
    } else {
    }
    %c0_i32_2 = arith.constant 0 : i32
    %7 = arith.cmpi eq, %arg1, %c0_i32_2 : i32
    %8 = arith.extui %7 : i1 to i32
    %c0_i32_3 = arith.constant 0 : i32
    %9 = arith.cmpi ne, %8, %c0_i32_3 : i32
    scf.if %9 {
      %c0_i32_78 = arith.constant 0 : i32
      %c0_i32_79 = arith.constant 0 : i32
      %c0_i32_80 = arith.constant 0 : i32
      %c0_i32_81 = arith.constant 0 : i32
      %c0_i32_82 = arith.constant 0 : i32
      %c0_i32_83 = arith.constant 0 : i32
      %318 = tpu.memref_slice %arg2[%arg0, %c0_i32_78, %c0_i32_81, %c0_i32_82, %c0_i32_83] : memref<2x4x6x6x128xf32, #tpu.memory_space<any>> -> memref<1x1x6x6x128xf32, #tpu.memory_space<any>>
      %319 = tpu.memref_squeeze %318 : memref<1x1x6x6x128xf32, #tpu.memory_space<any>> -> memref<6x6x128xf32, #tpu.memory_space<any>>
      %c1_i32_84 = arith.constant 1 : i32
      %c1_i32_85 = arith.constant 1 : i32
      %c0_i32_86 = arith.constant 0 : i32
      %320 = tpu.memref_slice %arg6[%c0_i32_79, %c1_i32_84, %c1_i32_85, %c0_i32_86] : memref<4x8x8x128xf32, #tpu.memory_space<vmem>> -> memref<1x6x6x128xf32, #tpu.memory_space<vmem>>
      %321 = tpu.memref_squeeze %320 : memref<1x6x6x128xf32, #tpu.memory_space<vmem>> -> memref<6x6x128xf32, #tpu.memory_space<vmem>>
      %322 = tpu.memref_slice %arg7[%c0_i32_80] : memref<4x!tpu.dma_semaphore, #tpu.memory_space<semaphore_mem>> -> memref<1x!tpu.dma_semaphore, #tpu.memory_space<semaphore_mem>>
      %323 = tpu.memref_squeeze %322 : memref<1x!tpu.dma_semaphore, #tpu.memory_space<semaphore_mem>> -> memref<!tpu.dma_semaphore, #tpu.memory_space<semaphore_mem>>
      tpu.wait_dma2 semaphore(%323 : memref<!tpu.dma_semaphore, #tpu.memory_space<semaphore_mem>>) src(%319 : memref<6x6x128xf32, #tpu.memory_space<any>>) dst(%321 : memref<6x6x128xf32, #tpu.memory_space<vmem>>)
      %c0_i32_87 = arith.constant 0 : i32
      %c1_i32_88 = arith.constant 1 : i32
      %c1_i32_89 = arith.constant 1 : i32
      %c0_i32_90 = arith.constant 0 : i32
      %c0_i32_91 = arith.constant 0 : i32
      %c0_i32_92 = arith.constant 0 : i32
      %324 = tpu.memref_slice %arg2[%arg0, %c0_i32_87, %c0_i32_90, %c0_i32_91, %c0_i32_92] : memref<2x4x6x6x128xf32, #tpu.memory_space<any>> -> memref<1x1x6x6x128xf32, #tpu.memory_space<any>>
      %325 = tpu.memref_squeeze %324 : memref<1x1x6x6x128xf32, #tpu.memory_space<any>> -> memref<6x6x128xf32, #tpu.memory_space<any>>
      %c1_i32_93 = arith.constant 1 : i32
      %c1_i32_94 = arith.constant 1 : i32
      %c0_i32_95 = arith.constant 0 : i32
      %326 = tpu.memref_slice %arg6[%c1_i32_88, %c1_i32_93, %c1_i32_94, %c0_i32_95] : memref<4x8x8x128xf32, #tpu.memory_space<vmem>> -> memref<1x6x6x128xf32, #tpu.memory_space<vmem>>
      %327 = tpu.memref_squeeze %326 : memref<1x6x6x128xf32, #tpu.memory_space<vmem>> -> memref<6x6x128xf32, #tpu.memory_space<vmem>>
      %328 = tpu.memref_slice %arg7[%c1_i32_89] : memref<4x!tpu.dma_semaphore, #tpu.memory_space<semaphore_mem>> -> memref<1x!tpu.dma_semaphore, #tpu.memory_space<semaphore_mem>>
      %329 = tpu.memref_squeeze %328 : memref<1x!tpu.dma_semaphore, #tpu.memory_space<semaphore_mem>> -> memref<!tpu.dma_semaphore, #tpu.memory_space<semaphore_mem>>
      tpu.wait_dma2 semaphore(%329 : memref<!tpu.dma_semaphore, #tpu.memory_space<semaphore_mem>>) src(%325 : memref<6x6x128xf32, #tpu.memory_space<any>>) dst(%327 : memref<6x6x128xf32, #tpu.memory_space<vmem>>)
      %c0_i32_96 = arith.constant 0 : i32
      %c2_i32_97 = arith.constant 2 : i32
      %c2_i32_98 = arith.constant 2 : i32
      %c0_i32_99 = arith.constant 0 : i32
      %c0_i32_100 = arith.constant 0 : i32
      %c0_i32_101 = arith.constant 0 : i32
      %330 = tpu.memref_slice %arg2[%arg0, %c0_i32_96, %c0_i32_99, %c0_i32_100, %c0_i32_101] : memref<2x4x6x6x128xf32, #tpu.memory_space<any>> -> memref<1x1x6x6x128xf32, #tpu.memory_space<any>>
      %331 = tpu.memref_squeeze %330 : memref<1x1x6x6x128xf32, #tpu.memory_space<any>> -> memref<6x6x128xf32, #tpu.memory_space<any>>
      %c1_i32_102 = arith.constant 1 : i32
      %c1_i32_103 = arith.constant 1 : i32
      %c0_i32_104 = arith.constant 0 : i32
      %332 = tpu.memref_slice %arg6[%c2_i32_97, %c1_i32_102, %c1_i32_103, %c0_i32_104] : memref<4x8x8x128xf32, #tpu.memory_space<vmem>> -> memref<1x6x6x128xf32, #tpu.memory_space<vmem>>
      %333 = tpu.memref_squeeze %332 : memref<1x6x6x128xf32, #tpu.memory_space<vmem>> -> memref<6x6x128xf32, #tpu.memory_space<vmem>>
      %334 = tpu.memref_slice %arg7[%c2_i32_98] : memref<4x!tpu.dma_semaphore, #tpu.memory_space<semaphore_mem>> -> memref<1x!tpu.dma_semaphore, #tpu.memory_space<semaphore_mem>>
      %335 = tpu.memref_squeeze %334 : memref<1x!tpu.dma_semaphore, #tpu.memory_space<semaphore_mem>> -> memref<!tpu.dma_semaphore, #tpu.memory_space<semaphore_mem>>
      tpu.wait_dma2 semaphore(%335 : memref<!tpu.dma_semaphore, #tpu.memory_space<semaphore_mem>>) src(%331 : memref<6x6x128xf32, #tpu.memory_space<any>>) dst(%333 : memref<6x6x128xf32, #tpu.memory_space<vmem>>)
    } else {
    }
    %c0_i32_4 = arith.constant 0 : i32
    %10 = arith.cmpi sgt, %arg1, %c0_i32_4 : i32
    %11 = arith.extui %10 : i1 to i32
    %c0_i32_5 = arith.constant 0 : i32
    %12 = arith.cmpi ne, %11, %c0_i32_5 : i32
    scf.if %12 {
      %c2_i32_78 = arith.constant 2 : i32
      %318 = arith.addi %arg1, %c2_i32_78 : i32
      %c4_i32_79 = arith.constant 4 : i32
      %c0_i32_80 = arith.constant 0 : i32
      %319 = arith.cmpi eq, %c4_i32_79, %c0_i32_80 : i32
      %c1_i32_81 = arith.constant 1 : i32
      %320 = arith.select %319, %c1_i32_81, %c4_i32_79 : i32
      %321 = arith.remsi %318, %320 : i32
      %c0_i32_82 = arith.constant 0 : i32
      %322 = arith.cmpi ne, %321, %c0_i32_82 : i32
      %c0_i32_83 = arith.constant 0 : i32
      %323 = arith.cmpi slt, %321, %c0_i32_83 : i32
      %c0_i32_84 = arith.constant 0 : i32
      %324 = arith.cmpi slt, %320, %c0_i32_84 : i32
      %325 = arith.xori %323, %324 : i1
      %326 = arith.andi %325, %322 : i1
      %327 = arith.addi %321, %320 : i32
      %328 = arith.select %326, %327, %321 : i32
      %c0_i32_85 = arith.constant 0 : i32
      %c0_i32_86 = arith.constant 0 : i32
      %c0_i32_87 = arith.constant 0 : i32
      %c0_i32_88 = arith.constant 0 : i32
      %329 = tpu.memref_slice %arg2[%arg0, %c0_i32_85, %c0_i32_86, %c0_i32_87, %c0_i32_88] : memref<2x4x6x6x128xf32, #tpu.memory_space<any>> -> memref<1x1x6x6x128xf32, #tpu.memory_space<any>>
      %330 = tpu.memref_squeeze %329 : memref<1x1x6x6x128xf32, #tpu.memory_space<any>> -> memref<6x6x128xf32, #tpu.memory_space<any>>
      %c1_i32_89 = arith.constant 1 : i32
      %c1_i32_90 = arith.constant 1 : i32
      %c0_i32_91 = arith.constant 0 : i32
      %331 = tpu.memref_slice %arg6[%328, %c1_i32_89, %c1_i32_90, %c0_i32_91] : memref<4x8x8x128xf32, #tpu.memory_space<vmem>> -> memref<1x6x6x128xf32, #tpu.memory_space<vmem>>
      %332 = tpu.memref_squeeze %331 : memref<1x6x6x128xf32, #tpu.memory_space<vmem>> -> memref<6x6x128xf32, #tpu.memory_space<vmem>>
      %333 = tpu.memref_slice %arg7[%328] : memref<4x!tpu.dma_semaphore, #tpu.memory_space<semaphore_mem>> -> memref<1x!tpu.dma_semaphore, #tpu.memory_space<semaphore_mem>>
      %334 = tpu.memref_squeeze %333 : memref<1x!tpu.dma_semaphore, #tpu.memory_space<semaphore_mem>> -> memref<!tpu.dma_semaphore, #tpu.memory_space<semaphore_mem>>
      tpu.wait_dma2 semaphore(%334 : memref<!tpu.dma_semaphore, #tpu.memory_space<semaphore_mem>>) src(%330 : memref<6x6x128xf32, #tpu.memory_space<any>>) dst(%332 : memref<6x6x128xf32, #tpu.memory_space<vmem>>)
    } else {
    }
    %c0 = arith.constant 0 : index
    %c0_6 = arith.constant 0 : index
    %c0_7 = arith.constant 0 : index
    %13 = vector.load %arg3[%c0, %c0_6, %c0_7] : memref<3x9x128xf32, #tpu.memory_space<vmem>>, vector<3x9x128xf32>
    %c0_i32_8 = arith.constant 0 : i32
    %14 = arith.addi %arg1, %c0_i32_8 : i32
    %c1_i32_9 = arith.constant 1 : i32
    %15 = arith.subi %14, %c1_i32_9 : i32
    %c0_i32_10 = arith.constant 0 : i32
    %16 = arith.cmpi sge, %15, %c0_i32_10 : i32
    %c4_i32_11 = arith.constant 4 : i32
    %17 = arith.cmpi slt, %15, %c4_i32_11 : i32
    %18 = arith.andi %16, %17 : i1
    %19 = vector.extract_strided_slice %13 {offsets = [0, 0, 0], sizes = [1, 9, 128], strides = [1, 1, 1]} : vector<3x9x128xf32> to vector<1x9x128xf32>
    %20 = vector.shape_cast %19 : vector<1x9x128xf32> to vector<9x128xf32>
    %cst = arith.constant 0.000000e+00 : f32
    %21 = vector.broadcast %cst : f32 to vector<9x128xf32>
    %22 = arith.select %18, %20, %21 : vector<9x128xf32>
    %23 = vector.extract_strided_slice %22 {offsets = [0, 0], sizes = [1, 128], strides = [1, 1]} : vector<9x128xf32> to vector<1x128xf32>
    %24 = vector.shape_cast %23 : vector<1x128xf32> to vector<128xf32>
    %25 = vector.extract_strided_slice %22 {offsets = [1, 0], sizes = [1, 128], strides = [1, 1]} : vector<9x128xf32> to vector<1x128xf32>
    %26 = vector.shape_cast %25 : vector<1x128xf32> to vector<128xf32>
    %27 = vector.extract_strided_slice %22 {offsets = [2, 0], sizes = [1, 128], strides = [1, 1]} : vector<9x128xf32> to vector<1x128xf32>
    %28 = vector.shape_cast %27 : vector<1x128xf32> to vector<128xf32>
    %29 = vector.extract_strided_slice %22 {offsets = [3, 0], sizes = [1, 128], strides = [1, 1]} : vector<9x128xf32> to vector<1x128xf32>
    %30 = vector.shape_cast %29 : vector<1x128xf32> to vector<128xf32>
    %31 = vector.extract_strided_slice %22 {offsets = [4, 0], sizes = [1, 128], strides = [1, 1]} : vector<9x128xf32> to vector<1x128xf32>
    %32 = vector.shape_cast %31 : vector<1x128xf32> to vector<128xf32>
    %33 = vector.extract_strided_slice %22 {offsets = [5, 0], sizes = [1, 128], strides = [1, 1]} : vector<9x128xf32> to vector<1x128xf32>
    %34 = vector.shape_cast %33 : vector<1x128xf32> to vector<128xf32>
    %35 = vector.extract_strided_slice %22 {offsets = [6, 0], sizes = [1, 128], strides = [1, 1]} : vector<9x128xf32> to vector<1x128xf32>
    %36 = vector.shape_cast %35 : vector<1x128xf32> to vector<128xf32>
    %37 = vector.extract_strided_slice %22 {offsets = [7, 0], sizes = [1, 128], strides = [1, 1]} : vector<9x128xf32> to vector<1x128xf32>
    %38 = vector.shape_cast %37 : vector<1x128xf32> to vector<128xf32>
    %39 = vector.extract_strided_slice %22 {offsets = [8, 0], sizes = [1, 128], strides = [1, 1]} : vector<9x128xf32> to vector<1x128xf32>
    %40 = vector.shape_cast %39 : vector<1x128xf32> to vector<128xf32>
    %c1_i32_12 = arith.constant 1 : i32
    %41 = arith.addi %arg1, %c1_i32_12 : i32
    %c1_i32_13 = arith.constant 1 : i32
    %42 = arith.subi %41, %c1_i32_13 : i32
    %c0_i32_14 = arith.constant 0 : i32
    %43 = arith.cmpi sge, %42, %c0_i32_14 : i32
    %c4_i32_15 = arith.constant 4 : i32
    %44 = arith.cmpi slt, %42, %c4_i32_15 : i32
    %45 = arith.andi %43, %44 : i1
    %46 = vector.extract_strided_slice %13 {offsets = [1, 0, 0], sizes = [1, 9, 128], strides = [1, 1, 1]} : vector<3x9x128xf32> to vector<1x9x128xf32>
    %47 = vector.shape_cast %46 : vector<1x9x128xf32> to vector<9x128xf32>
    %cst_16 = arith.constant 0.000000e+00 : f32
    %48 = vector.broadcast %cst_16 : f32 to vector<9x128xf32>
    %49 = arith.select %45, %47, %48 : vector<9x128xf32>
    %50 = vector.extract_strided_slice %49 {offsets = [0, 0], sizes = [1, 128], strides = [1, 1]} : vector<9x128xf32> to vector<1x128xf32>
    %51 = vector.shape_cast %50 : vector<1x128xf32> to vector<128xf32>
    %52 = vector.extract_strided_slice %49 {offsets = [1, 0], sizes = [1, 128], strides = [1, 1]} : vector<9x128xf32> to vector<1x128xf32>
    %53 = vector.shape_cast %52 : vector<1x128xf32> to vector<128xf32>
    %54 = vector.extract_strided_slice %49 {offsets = [2, 0], sizes = [1, 128], strides = [1, 1]} : vector<9x128xf32> to vector<1x128xf32>
    %55 = vector.shape_cast %54 : vector<1x128xf32> to vector<128xf32>
    %56 = vector.extract_strided_slice %49 {offsets = [3, 0], sizes = [1, 128], strides = [1, 1]} : vector<9x128xf32> to vector<1x128xf32>
    %57 = vector.shape_cast %56 : vector<1x128xf32> to vector<128xf32>
    %58 = vector.extract_strided_slice %49 {offsets = [4, 0], sizes = [1, 128], strides = [1, 1]} : vector<9x128xf32> to vector<1x128xf32>
    %59 = vector.shape_cast %58 : vector<1x128xf32> to vector<128xf32>
    %60 = vector.extract_strided_slice %49 {offsets = [5, 0], sizes = [1, 128], strides = [1, 1]} : vector<9x128xf32> to vector<1x128xf32>
    %61 = vector.shape_cast %60 : vector<1x128xf32> to vector<128xf32>
    %62 = vector.extract_strided_slice %49 {offsets = [6, 0], sizes = [1, 128], strides = [1, 1]} : vector<9x128xf32> to vector<1x128xf32>
    %63 = vector.shape_cast %62 : vector<1x128xf32> to vector<128xf32>
    %64 = vector.extract_strided_slice %49 {offsets = [7, 0], sizes = [1, 128], strides = [1, 1]} : vector<9x128xf32> to vector<1x128xf32>
    %65 = vector.shape_cast %64 : vector<1x128xf32> to vector<128xf32>
    %66 = vector.extract_strided_slice %49 {offsets = [8, 0], sizes = [1, 128], strides = [1, 1]} : vector<9x128xf32> to vector<1x128xf32>
    %67 = vector.shape_cast %66 : vector<1x128xf32> to vector<128xf32>
    %c2_i32 = arith.constant 2 : i32
    %68 = arith.addi %arg1, %c2_i32 : i32
    %c1_i32_17 = arith.constant 1 : i32
    %69 = arith.subi %68, %c1_i32_17 : i32
    %c0_i32_18 = arith.constant 0 : i32
    %70 = arith.cmpi sge, %69, %c0_i32_18 : i32
    %c4_i32_19 = arith.constant 4 : i32
    %71 = arith.cmpi slt, %69, %c4_i32_19 : i32
    %72 = arith.andi %70, %71 : i1
    %73 = vector.extract_strided_slice %13 {offsets = [2, 0, 0], sizes = [1, 9, 128], strides = [1, 1, 1]} : vector<3x9x128xf32> to vector<1x9x128xf32>
    %74 = vector.shape_cast %73 : vector<1x9x128xf32> to vector<9x128xf32>
    %cst_20 = arith.constant 0.000000e+00 : f32
    %75 = vector.broadcast %cst_20 : f32 to vector<9x128xf32>
    %76 = arith.select %72, %74, %75 : vector<9x128xf32>
    %77 = vector.extract_strided_slice %76 {offsets = [0, 0], sizes = [1, 128], strides = [1, 1]} : vector<9x128xf32> to vector<1x128xf32>
    %78 = vector.shape_cast %77 : vector<1x128xf32> to vector<128xf32>
    %79 = vector.extract_strided_slice %76 {offsets = [1, 0], sizes = [1, 128], strides = [1, 1]} : vector<9x128xf32> to vector<1x128xf32>
    %80 = vector.shape_cast %79 : vector<1x128xf32> to vector<128xf32>
    %81 = vector.extract_strided_slice %76 {offsets = [2, 0], sizes = [1, 128], strides = [1, 1]} : vector<9x128xf32> to vector<1x128xf32>
    %82 = vector.shape_cast %81 : vector<1x128xf32> to vector<128xf32>
    %83 = vector.extract_strided_slice %76 {offsets = [3, 0], sizes = [1, 128], strides = [1, 1]} : vector<9x128xf32> to vector<1x128xf32>
    %84 = vector.shape_cast %83 : vector<1x128xf32> to vector<128xf32>
    %85 = vector.extract_strided_slice %76 {offsets = [4, 0], sizes = [1, 128], strides = [1, 1]} : vector<9x128xf32> to vector<1x128xf32>
    %86 = vector.shape_cast %85 : vector<1x128xf32> to vector<128xf32>
    %87 = vector.extract_strided_slice %76 {offsets = [5, 0], sizes = [1, 128], strides = [1, 1]} : vector<9x128xf32> to vector<1x128xf32>
    %88 = vector.shape_cast %87 : vector<1x128xf32> to vector<128xf32>
    %89 = vector.extract_strided_slice %76 {offsets = [6, 0], sizes = [1, 128], strides = [1, 1]} : vector<9x128xf32> to vector<1x128xf32>
    %90 = vector.shape_cast %89 : vector<1x128xf32> to vector<128xf32>
    %91 = vector.extract_strided_slice %76 {offsets = [7, 0], sizes = [1, 128], strides = [1, 1]} : vector<9x128xf32> to vector<1x128xf32>
    %92 = vector.shape_cast %91 : vector<1x128xf32> to vector<128xf32>
    %93 = vector.extract_strided_slice %76 {offsets = [8, 0], sizes = [1, 128], strides = [1, 1]} : vector<9x128xf32> to vector<1x128xf32>
    %94 = vector.shape_cast %93 : vector<1x128xf32> to vector<128xf32>
    %c0_21 = arith.constant 0 : index
    %c0_22 = arith.constant 0 : index
    %95 = vector.load %arg4[%c0_21, %c0_22] : memref<1x128xf32, #tpu.memory_space<vmem>>, vector<1x128xf32>
    %96 = vector.shape_cast %95 : vector<1x128xf32> to vector<128xf32>
    %97 = vector.shape_cast %96 : vector<128xf32> to vector<1x1x128xf32>
    %98 = vector.broadcast %97 : vector<1x1x128xf32> to vector<6x6x128xf32>
    %c0_i32_23 = arith.constant 0 : i32
    %c6_i32 = arith.constant 6 : i32
    %99 = arith.muli %c0_i32_23, %c6_i32 : i32
    %c0_i32_24 = arith.constant 0 : i32
    %100 = arith.minsi %99, %c0_i32_24 : i32
    %c0_i32_25 = arith.constant 0 : i32
    %101 = arith.addi %arg1, %c0_i32_25 : i32
    %c4_i32_26 = arith.constant 4 : i32
    %c0_i32_27 = arith.constant 0 : i32
    %102 = arith.cmpi eq, %c4_i32_26, %c0_i32_27 : i32
    %c1_i32_28 = arith.constant 1 : i32
    %103 = arith.select %102, %c1_i32_28, %c4_i32_26 : i32
    %104 = arith.remsi %101, %103 : i32
    %c0_i32_29 = arith.constant 0 : i32
    %105 = arith.cmpi ne, %104, %c0_i32_29 : i32
    %c0_i32_30 = arith.constant 0 : i32
    %106 = arith.cmpi slt, %104, %c0_i32_30 : i32
    %c0_i32_31 = arith.constant 0 : i32
    %107 = arith.cmpi slt, %103, %c0_i32_31 : i32
    %108 = arith.xori %106, %107 : i1
    %109 = arith.andi %108, %105 : i1
    %110 = arith.addi %104, %103 : i32
    %111 = arith.select %109, %110, %104 : i32
    %c0_i32_32 = arith.constant 0 : i32
    %112 = arith.addi %100, %c0_i32_32 : i32
    %113 = arith.index_cast %111 : i32 to index
    %114 = arith.index_cast %112 : i32 to index
    %c0_33 = arith.constant 0 : index
    %c0_34 = arith.constant 0 : index
    %115 = vector.load %arg6[%113, %114, %c0_33, %c0_34] : memref<4x8x8x128xf32, #tpu.memory_space<vmem>>, vector<1x6x8x128xf32>
    %116 = vector.shape_cast %115 : vector<1x6x8x128xf32> to vector<6x8x128xf32>
    %117 = vector.extract_strided_slice %116 {offsets = [0, 0, 0], sizes = [6, 6, 128], strides = [1, 1, 1]} : vector<6x8x128xf32> to vector<6x6x128xf32>
    %118 = vector.shape_cast %24 : vector<128xf32> to vector<1x1x128xf32>
    %119 = vector.broadcast %118 : vector<1x1x128xf32> to vector<6x6x128xf32>
    %120 = arith.mulf %117, %119 : vector<6x6x128xf32>
    %121 = arith.addf %98, %120 : vector<6x6x128xf32>
    %122 = vector.extract_strided_slice %116 {offsets = [0, 1, 0], sizes = [6, 6, 128], strides = [1, 1, 1]} : vector<6x8x128xf32> to vector<6x6x128xf32>
    %123 = vector.shape_cast %26 : vector<128xf32> to vector<1x1x128xf32>
    %124 = vector.broadcast %123 : vector<1x1x128xf32> to vector<6x6x128xf32>
    %125 = arith.mulf %122, %124 : vector<6x6x128xf32>
    %126 = arith.addf %121, %125 : vector<6x6x128xf32>
    %127 = vector.extract_strided_slice %116 {offsets = [0, 2, 0], sizes = [6, 6, 128], strides = [1, 1, 1]} : vector<6x8x128xf32> to vector<6x6x128xf32>
    %128 = vector.shape_cast %28 : vector<128xf32> to vector<1x1x128xf32>
    %129 = vector.broadcast %128 : vector<1x1x128xf32> to vector<6x6x128xf32>
    %130 = arith.mulf %127, %129 : vector<6x6x128xf32>
    %131 = arith.addf %126, %130 : vector<6x6x128xf32>
    %c1_i32_35 = arith.constant 1 : i32
    %132 = arith.addi %100, %c1_i32_35 : i32
    %133 = arith.index_cast %111 : i32 to index
    %134 = arith.index_cast %132 : i32 to index
    %c0_36 = arith.constant 0 : index
    %c0_37 = arith.constant 0 : index
    %135 = vector.load %arg6[%133, %134, %c0_36, %c0_37] : memref<4x8x8x128xf32, #tpu.memory_space<vmem>>, vector<1x6x8x128xf32>
    %136 = vector.shape_cast %135 : vector<1x6x8x128xf32> to vector<6x8x128xf32>
    %137 = vector.extract_strided_slice %136 {offsets = [0, 0, 0], sizes = [6, 6, 128], strides = [1, 1, 1]} : vector<6x8x128xf32> to vector<6x6x128xf32>
    %138 = vector.shape_cast %30 : vector<128xf32> to vector<1x1x128xf32>
    %139 = vector.broadcast %138 : vector<1x1x128xf32> to vector<6x6x128xf32>
    %140 = arith.mulf %137, %139 : vector<6x6x128xf32>
    %141 = arith.addf %131, %140 : vector<6x6x128xf32>
    %142 = vector.extract_strided_slice %136 {offsets = [0, 1, 0], sizes = [6, 6, 128], strides = [1, 1, 1]} : vector<6x8x128xf32> to vector<6x6x128xf32>
    %143 = vector.shape_cast %32 : vector<128xf32> to vector<1x1x128xf32>
    %144 = vector.broadcast %143 : vector<1x1x128xf32> to vector<6x6x128xf32>
    %145 = arith.mulf %142, %144 : vector<6x6x128xf32>
    %146 = arith.addf %141, %145 : vector<6x6x128xf32>
    %147 = vector.extract_strided_slice %136 {offsets = [0, 2, 0], sizes = [6, 6, 128], strides = [1, 1, 1]} : vector<6x8x128xf32> to vector<6x6x128xf32>
    %148 = vector.shape_cast %34 : vector<128xf32> to vector<1x1x128xf32>
    %149 = vector.broadcast %148 : vector<1x1x128xf32> to vector<6x6x128xf32>
    %150 = arith.mulf %147, %149 : vector<6x6x128xf32>
    %151 = arith.addf %146, %150 : vector<6x6x128xf32>
    %c2_i32_38 = arith.constant 2 : i32
    %152 = arith.addi %100, %c2_i32_38 : i32
    %153 = arith.index_cast %111 : i32 to index
    %154 = arith.index_cast %152 : i32 to index
    %c0_39 = arith.constant 0 : index
    %c0_40 = arith.constant 0 : index
    %155 = vector.load %arg6[%153, %154, %c0_39, %c0_40] : memref<4x8x8x128xf32, #tpu.memory_space<vmem>>, vector<1x6x8x128xf32>
    %156 = vector.shape_cast %155 : vector<1x6x8x128xf32> to vector<6x8x128xf32>
    %157 = vector.extract_strided_slice %156 {offsets = [0, 0, 0], sizes = [6, 6, 128], strides = [1, 1, 1]} : vector<6x8x128xf32> to vector<6x6x128xf32>
    %158 = vector.shape_cast %36 : vector<128xf32> to vector<1x1x128xf32>
    %159 = vector.broadcast %158 : vector<1x1x128xf32> to vector<6x6x128xf32>
    %160 = arith.mulf %157, %159 : vector<6x6x128xf32>
    %161 = arith.addf %151, %160 : vector<6x6x128xf32>
    %162 = vector.extract_strided_slice %156 {offsets = [0, 1, 0], sizes = [6, 6, 128], strides = [1, 1, 1]} : vector<6x8x128xf32> to vector<6x6x128xf32>
    %163 = vector.shape_cast %38 : vector<128xf32> to vector<1x1x128xf32>
    %164 = vector.broadcast %163 : vector<1x1x128xf32> to vector<6x6x128xf32>
    %165 = arith.mulf %162, %164 : vector<6x6x128xf32>
    %166 = arith.addf %161, %165 : vector<6x6x128xf32>
    %167 = vector.extract_strided_slice %156 {offsets = [0, 2, 0], sizes = [6, 6, 128], strides = [1, 1, 1]} : vector<6x8x128xf32> to vector<6x6x128xf32>
    %168 = vector.shape_cast %40 : vector<128xf32> to vector<1x1x128xf32>
    %169 = vector.broadcast %168 : vector<1x1x128xf32> to vector<6x6x128xf32>
    %170 = arith.mulf %167, %169 : vector<6x6x128xf32>
    %171 = arith.addf %166, %170 : vector<6x6x128xf32>
    %c1_i32_41 = arith.constant 1 : i32
    %172 = arith.addi %arg1, %c1_i32_41 : i32
    %c4_i32_42 = arith.constant 4 : i32
    %c0_i32_43 = arith.constant 0 : i32
    %173 = arith.cmpi eq, %c4_i32_42, %c0_i32_43 : i32
    %c1_i32_44 = arith.constant 1 : i32
    %174 = arith.select %173, %c1_i32_44, %c4_i32_42 : i32
    %175 = arith.remsi %172, %174 : i32
    %c0_i32_45 = arith.constant 0 : i32
    %176 = arith.cmpi ne, %175, %c0_i32_45 : i32
    %c0_i32_46 = arith.constant 0 : i32
    %177 = arith.cmpi slt, %175, %c0_i32_46 : i32
    %c0_i32_47 = arith.constant 0 : i32
    %178 = arith.cmpi slt, %174, %c0_i32_47 : i32
    %179 = arith.xori %177, %178 : i1
    %180 = arith.andi %179, %176 : i1
    %181 = arith.addi %175, %174 : i32
    %182 = arith.select %180, %181, %175 : i32
    %c0_i32_48 = arith.constant 0 : i32
    %183 = arith.addi %100, %c0_i32_48 : i32
    %184 = arith.index_cast %182 : i32 to index
    %185 = arith.index_cast %183 : i32 to index
    %c0_49 = arith.constant 0 : index
    %c0_50 = arith.constant 0 : index
    %186 = vector.load %arg6[%184, %185, %c0_49, %c0_50] : memref<4x8x8x128xf32, #tpu.memory_space<vmem>>, vector<1x6x8x128xf32>
    %187 = vector.shape_cast %186 : vector<1x6x8x128xf32> to vector<6x8x128xf32>
    %188 = vector.extract_strided_slice %187 {offsets = [0, 0, 0], sizes = [6, 6, 128], strides = [1, 1, 1]} : vector<6x8x128xf32> to vector<6x6x128xf32>
    %189 = vector.shape_cast %51 : vector<128xf32> to vector<1x1x128xf32>
    %190 = vector.broadcast %189 : vector<1x1x128xf32> to vector<6x6x128xf32>
    %191 = arith.mulf %188, %190 : vector<6x6x128xf32>
    %192 = arith.addf %171, %191 : vector<6x6x128xf32>
    %193 = vector.extract_strided_slice %187 {offsets = [0, 1, 0], sizes = [6, 6, 128], strides = [1, 1, 1]} : vector<6x8x128xf32> to vector<6x6x128xf32>
    %194 = vector.shape_cast %53 : vector<128xf32> to vector<1x1x128xf32>
    %195 = vector.broadcast %194 : vector<1x1x128xf32> to vector<6x6x128xf32>
    %196 = arith.mulf %193, %195 : vector<6x6x128xf32>
    %197 = arith.addf %192, %196 : vector<6x6x128xf32>
    %198 = vector.extract_strided_slice %187 {offsets = [0, 2, 0], sizes = [6, 6, 128], strides = [1, 1, 1]} : vector<6x8x128xf32> to vector<6x6x128xf32>
    %199 = vector.shape_cast %55 : vector<128xf32> to vector<1x1x128xf32>
    %200 = vector.broadcast %199 : vector<1x1x128xf32> to vector<6x6x128xf32>
    %201 = arith.mulf %198, %200 : vector<6x6x128xf32>
    %202 = arith.addf %197, %201 : vector<6x6x128xf32>
    %c1_i32_51 = arith.constant 1 : i32
    %203 = arith.addi %100, %c1_i32_51 : i32
    %204 = arith.index_cast %182 : i32 to index
    %205 = arith.index_cast %203 : i32 to index
    %c0_52 = arith.constant 0 : index
    %c0_53 = arith.constant 0 : index
    %206 = vector.load %arg6[%204, %205, %c0_52, %c0_53] : memref<4x8x8x128xf32, #tpu.memory_space<vmem>>, vector<1x6x8x128xf32>
    %207 = vector.shape_cast %206 : vector<1x6x8x128xf32> to vector<6x8x128xf32>
    %208 = vector.extract_strided_slice %207 {offsets = [0, 0, 0], sizes = [6, 6, 128], strides = [1, 1, 1]} : vector<6x8x128xf32> to vector<6x6x128xf32>
    %209 = vector.shape_cast %57 : vector<128xf32> to vector<1x1x128xf32>
    %210 = vector.broadcast %209 : vector<1x1x128xf32> to vector<6x6x128xf32>
    %211 = arith.mulf %208, %210 : vector<6x6x128xf32>
    %212 = arith.addf %202, %211 : vector<6x6x128xf32>
    %213 = vector.extract_strided_slice %207 {offsets = [0, 1, 0], sizes = [6, 6, 128], strides = [1, 1, 1]} : vector<6x8x128xf32> to vector<6x6x128xf32>
    %214 = vector.shape_cast %59 : vector<128xf32> to vector<1x1x128xf32>
    %215 = vector.broadcast %214 : vector<1x1x128xf32> to vector<6x6x128xf32>
    %216 = arith.mulf %213, %215 : vector<6x6x128xf32>
    %217 = arith.addf %212, %216 : vector<6x6x128xf32>
    %218 = vector.extract_strided_slice %207 {offsets = [0, 2, 0], sizes = [6, 6, 128], strides = [1, 1, 1]} : vector<6x8x128xf32> to vector<6x6x128xf32>
    %219 = vector.shape_cast %61 : vector<128xf32> to vector<1x1x128xf32>
    %220 = vector.broadcast %219 : vector<1x1x128xf32> to vector<6x6x128xf32>
    %221 = arith.mulf %218, %220 : vector<6x6x128xf32>
    %222 = arith.addf %217, %221 : vector<6x6x128xf32>
    %c2_i32_54 = arith.constant 2 : i32
    %223 = arith.addi %100, %c2_i32_54 : i32
    %224 = arith.index_cast %182 : i32 to index
    %225 = arith.index_cast %223 : i32 to index
    %c0_55 = arith.constant 0 : index
    %c0_56 = arith.constant 0 : index
    %226 = vector.load %arg6[%224, %225, %c0_55, %c0_56] : memref<4x8x8x128xf32, #tpu.memory_space<vmem>>, vector<1x6x8x128xf32>
    %227 = vector.shape_cast %226 : vector<1x6x8x128xf32> to vector<6x8x128xf32>
    %228 = vector.extract_strided_slice %227 {offsets = [0, 0, 0], sizes = [6, 6, 128], strides = [1, 1, 1]} : vector<6x8x128xf32> to vector<6x6x128xf32>
    %229 = vector.shape_cast %63 : vector<128xf32> to vector<1x1x128xf32>
    %230 = vector.broadcast %229 : vector<1x1x128xf32> to vector<6x6x128xf32>
    %231 = arith.mulf %228, %230 : vector<6x6x128xf32>
    %232 = arith.addf %222, %231 : vector<6x6x128xf32>
    %233 = vector.extract_strided_slice %227 {offsets = [0, 1, 0], sizes = [6, 6, 128], strides = [1, 1, 1]} : vector<6x8x128xf32> to vector<6x6x128xf32>
    %234 = vector.shape_cast %65 : vector<128xf32> to vector<1x1x128xf32>
    %235 = vector.broadcast %234 : vector<1x1x128xf32> to vector<6x6x128xf32>
    %236 = arith.mulf %233, %235 : vector<6x6x128xf32>
    %237 = arith.addf %232, %236 : vector<6x6x128xf32>
    %238 = vector.extract_strided_slice %227 {offsets = [0, 2, 0], sizes = [6, 6, 128], strides = [1, 1, 1]} : vector<6x8x128xf32> to vector<6x6x128xf32>
    %239 = vector.shape_cast %67 : vector<128xf32> to vector<1x1x128xf32>
    %240 = vector.broadcast %239 : vector<1x1x128xf32> to vector<6x6x128xf32>
    %241 = arith.mulf %238, %240 : vector<6x6x128xf32>
    %242 = arith.addf %237, %241 : vector<6x6x128xf32>
    %c2_i32_57 = arith.constant 2 : i32
    %243 = arith.addi %arg1, %c2_i32_57 : i32
    %c4_i32_58 = arith.constant 4 : i32
    %c0_i32_59 = arith.constant 0 : i32
    %244 = arith.cmpi eq, %c4_i32_58, %c0_i32_59 : i32
    %c1_i32_60 = arith.constant 1 : i32
    %245 = arith.select %244, %c1_i32_60, %c4_i32_58 : i32
    %246 = arith.remsi %243, %245 : i32
    %c0_i32_61 = arith.constant 0 : i32
    %247 = arith.cmpi ne, %246, %c0_i32_61 : i32
    %c0_i32_62 = arith.constant 0 : i32
    %248 = arith.cmpi slt, %246, %c0_i32_62 : i32
    %c0_i32_63 = arith.constant 0 : i32
    %249 = arith.cmpi slt, %245, %c0_i32_63 : i32
    %250 = arith.xori %248, %249 : i1
    %251 = arith.andi %250, %247 : i1
    %252 = arith.addi %246, %245 : i32
    %253 = arith.select %251, %252, %246 : i32
    %c0_i32_64 = arith.constant 0 : i32
    %254 = arith.addi %100, %c0_i32_64 : i32
    %255 = arith.index_cast %253 : i32 to index
    %256 = arith.index_cast %254 : i32 to index
    %c0_65 = arith.constant 0 : index
    %c0_66 = arith.constant 0 : index
    %257 = vector.load %arg6[%255, %256, %c0_65, %c0_66] : memref<4x8x8x128xf32, #tpu.memory_space<vmem>>, vector<1x6x8x128xf32>
    %258 = vector.shape_cast %257 : vector<1x6x8x128xf32> to vector<6x8x128xf32>
    %259 = vector.extract_strided_slice %258 {offsets = [0, 0, 0], sizes = [6, 6, 128], strides = [1, 1, 1]} : vector<6x8x128xf32> to vector<6x6x128xf32>
    %260 = vector.shape_cast %78 : vector<128xf32> to vector<1x1x128xf32>
    %261 = vector.broadcast %260 : vector<1x1x128xf32> to vector<6x6x128xf32>
    %262 = arith.mulf %259, %261 : vector<6x6x128xf32>
    %263 = arith.addf %242, %262 : vector<6x6x128xf32>
    %264 = vector.extract_strided_slice %258 {offsets = [0, 1, 0], sizes = [6, 6, 128], strides = [1, 1, 1]} : vector<6x8x128xf32> to vector<6x6x128xf32>
    %265 = vector.shape_cast %80 : vector<128xf32> to vector<1x1x128xf32>
    %266 = vector.broadcast %265 : vector<1x1x128xf32> to vector<6x6x128xf32>
    %267 = arith.mulf %264, %266 : vector<6x6x128xf32>
    %268 = arith.addf %263, %267 : vector<6x6x128xf32>
    %269 = vector.extract_strided_slice %258 {offsets = [0, 2, 0], sizes = [6, 6, 128], strides = [1, 1, 1]} : vector<6x8x128xf32> to vector<6x6x128xf32>
    %270 = vector.shape_cast %82 : vector<128xf32> to vector<1x1x128xf32>
    %271 = vector.broadcast %270 : vector<1x1x128xf32> to vector<6x6x128xf32>
    %272 = arith.mulf %269, %271 : vector<6x6x128xf32>
    %273 = arith.addf %268, %272 : vector<6x6x128xf32>
    %c1_i32_67 = arith.constant 1 : i32
    %274 = arith.addi %100, %c1_i32_67 : i32
    %275 = arith.index_cast %253 : i32 to index
    %276 = arith.index_cast %274 : i32 to index
    %c0_68 = arith.constant 0 : index
    %c0_69 = arith.constant 0 : index
    %277 = vector.load %arg6[%275, %276, %c0_68, %c0_69] : memref<4x8x8x128xf32, #tpu.memory_space<vmem>>, vector<1x6x8x128xf32>
    %278 = vector.shape_cast %277 : vector<1x6x8x128xf32> to vector<6x8x128xf32>
    %279 = vector.extract_strided_slice %278 {offsets = [0, 0, 0], sizes = [6, 6, 128], strides = [1, 1, 1]} : vector<6x8x128xf32> to vector<6x6x128xf32>
    %280 = vector.shape_cast %84 : vector<128xf32> to vector<1x1x128xf32>
    %281 = vector.broadcast %280 : vector<1x1x128xf32> to vector<6x6x128xf32>
    %282 = arith.mulf %279, %281 : vector<6x6x128xf32>
    %283 = arith.addf %273, %282 : vector<6x6x128xf32>
    %284 = vector.extract_strided_slice %278 {offsets = [0, 1, 0], sizes = [6, 6, 128], strides = [1, 1, 1]} : vector<6x8x128xf32> to vector<6x6x128xf32>
    %285 = vector.shape_cast %86 : vector<128xf32> to vector<1x1x128xf32>
    %286 = vector.broadcast %285 : vector<1x1x128xf32> to vector<6x6x128xf32>
    %287 = arith.mulf %284, %286 : vector<6x6x128xf32>
    %288 = arith.addf %283, %287 : vector<6x6x128xf32>
    %289 = vector.extract_strided_slice %278 {offsets = [0, 2, 0], sizes = [6, 6, 128], strides = [1, 1, 1]} : vector<6x8x128xf32> to vector<6x6x128xf32>
    %290 = vector.shape_cast %88 : vector<128xf32> to vector<1x1x128xf32>
    %291 = vector.broadcast %290 : vector<1x1x128xf32> to vector<6x6x128xf32>
    %292 = arith.mulf %289, %291 : vector<6x6x128xf32>
    %293 = arith.addf %288, %292 : vector<6x6x128xf32>
    %c2_i32_70 = arith.constant 2 : i32
    %294 = arith.addi %100, %c2_i32_70 : i32
    %295 = arith.index_cast %253 : i32 to index
    %296 = arith.index_cast %294 : i32 to index
    %c0_71 = arith.constant 0 : index
    %c0_72 = arith.constant 0 : index
    %297 = vector.load %arg6[%295, %296, %c0_71, %c0_72] : memref<4x8x8x128xf32, #tpu.memory_space<vmem>>, vector<1x6x8x128xf32>
    %298 = vector.shape_cast %297 : vector<1x6x8x128xf32> to vector<6x8x128xf32>
    %299 = vector.extract_strided_slice %298 {offsets = [0, 0, 0], sizes = [6, 6, 128], strides = [1, 1, 1]} : vector<6x8x128xf32> to vector<6x6x128xf32>
    %300 = vector.shape_cast %90 : vector<128xf32> to vector<1x1x128xf32>
    %301 = vector.broadcast %300 : vector<1x1x128xf32> to vector<6x6x128xf32>
    %302 = arith.mulf %299, %301 : vector<6x6x128xf32>
    %303 = arith.addf %293, %302 : vector<6x6x128xf32>
    %304 = vector.extract_strided_slice %298 {offsets = [0, 1, 0], sizes = [6, 6, 128], strides = [1, 1, 1]} : vector<6x8x128xf32> to vector<6x6x128xf32>
    %305 = vector.shape_cast %92 : vector<128xf32> to vector<1x1x128xf32>
    %306 = vector.broadcast %305 : vector<1x1x128xf32> to vector<6x6x128xf32>
    %307 = arith.mulf %304, %306 : vector<6x6x128xf32>
    %308 = arith.addf %303, %307 : vector<6x6x128xf32>
    %309 = vector.extract_strided_slice %298 {offsets = [0, 2, 0], sizes = [6, 6, 128], strides = [1, 1, 1]} : vector<6x8x128xf32> to vector<6x6x128xf32>
    %310 = vector.shape_cast %94 : vector<128xf32> to vector<1x1x128xf32>
    %311 = vector.broadcast %310 : vector<1x1x128xf32> to vector<6x6x128xf32>
    %312 = arith.mulf %309, %311 : vector<6x6x128xf32>
    %313 = arith.addf %308, %312 : vector<6x6x128xf32>
    %c0_73 = arith.constant 0 : index
    %c0_74 = arith.constant 0 : index
    %314 = arith.index_cast %100 : i32 to index
    %c0_75 = arith.constant 0 : index
    %c0_76 = arith.constant 0 : index
    %315 = vector.load %arg5[%c0_73, %c0_74, %314, %c0_75, %c0_76] : memref<1x1x6x6x128xf32, #tpu.memory_space<vmem>>, vector<1x1x6x6x128xf32>
    %316 = vector.shape_cast %315 : vector<1x1x6x6x128xf32> to vector<6x6x128xf32>
    %317 = vector.shape_cast %313 : vector<6x6x128xf32> to vector<1x1x6x6x128xf32>
    tpu.vector_store %arg5[%c0_73, %c0_74, %314, %c0_75, %c0_76], %317 {strides = array<i32>} : memref<1x1x6x6x128xf32, #tpu.memory_space<vmem>>, vector<1x1x6x6x128xf32>,
    %c1_i32_77 = arith.constant 1 : i32
    return
  }
  func.func @transform_1(%arg0: i32, %arg1: i32) -> (i32, i32, i32) {
    %c0_i32 = arith.constant 0 : i32
    %c0_i32_0 = arith.constant 0 : i32
    %c0_i32_1 = arith.constant 0 : i32
    %c0_i32_2 = arith.constant 0 : i32
    return %c0_i32, %c0_i32_0, %c0_i32_1 : i32, i32, i32
  }
  func.func @transform_2(%arg0: i32, %arg1: i32) -> (i32, i32) {
    %c0_i32 = arith.constant 0 : i32
    %c0_i32_0 = arith.constant 0 : i32
    %c0_i32_1 = arith.constant 0 : i32
    return %c0_i32, %c0_i32_0 : i32, i32
  }
  func.func @transform_3(%arg0: i32, %arg1: i32) -> (i32, i32, i32, i32, i32) {
    %c0_i32 = arith.constant 0 : i32
    %c0_i32_0 = arith.constant 0 : i32
    %c0_i32_1 = arith.constant 0 : i32
    %c0_i32_2 = arith.constant 0 : i32
    return %arg0, %arg1, %c0_i32, %c0_i32_0, %c0_i32_1 : i32, i32, i32, i32, i32
  }
}

</mosaic_0001>

<bundles_post_ra>
// kernel: tpu_custom_call.1
= control target key start
LH: loop header
LB: loop body
LE: loop exit
PB: predicated region body
PF: predicated region fallthrough
CT: control target
= control target key end

     0   :  { %s1724_s12 = smov 0   ;;  %s1726_s13 = smov 0   ;;  %s2217_s0 = inlined_call_operand.vmem [shape: f32[2,4,6,6,128], index: 0, kind: input, shape index: {}]   ;;  %s2218_s1 = inlined_call_operand.vmem [shape: f32[3,9,128], index: 1, kind: input, shape index: {}]   ;;  %s2219_s2 = inlined_call_operand.vmem [shape: f32[1,128], index: 2, kind: input, shape index: {}]   ;;  %s2220_s3 = inlined_call_operand.vmem [shape: f32[2,4,6,6,128], index: 3, kind: output, shape index: {}]  }
   0x1   :  { %s1728_s14 = smov 0   ;;  %s1730_s15 = smov 0  }
   0x2   :  { %s1732_s16 = smov 0  }
   0x3 LB: > { %s22_s17 = sadd.s32 1, %s1693_s14  ;;  %s25_s18 = sadd.s32 1, %s1697_s15  ;;  %s1701_s16 = sphi %s1732_s16, %s13_s16   ;;  %s1697_s15 = sphi %s1730_s15, %s2230_s15   ;;  %s1693_s14 = sphi %s1728_s14, %s2229_s14   ;;  %s1689_s13 = sphi %s1726_s13, %s2228_s13   ;;  %s1685_s12 = sphi %s1724_s12, %s2227_s12  }
   0x4   : > { %p23_p0 = scmp.ge.s32.totalorder %s22_s17, 4  ;;  %p1491_p1 = scmp.ge.s32.totalorder %s1701_s16, 1 }
   0x5   : > { %p117_p2 = scmp.lt.s32.totalorder %s1701_s16, 9 }
   0x6   : > { %s2232_s17 = smov (%p23_p0, %s22_s17), 0  ;;  %s2234_s18 = smov (!%p23_p0, %s25_s18), %s1697_s15 }
   0x7   : > { %p118_p3 = pnand %p1491_p1, %p117_p2  ;;  %p27_p4 = scmp.ge.s32.totalorder %s2234_s18, 2 }
   0x8   : > { %p138_p5 = scmp.lt.s32.totalorder (!%p118_p3), %s1689_s13, 1  ;;  %p140_p6 = scmp.lt.s32.totalorder (!%p118_p3), %s1685_s12, 3 }
   0x9   : > { %s2236_s18 = smov (%p27_p4, %s2234_s18), 0  ;;  %121 = sbr.rel (%p118_p3) target bundleno = 257 (0x101), region = 28 }
   0xa   : > { %p1493_p7 = scmp.ne.s32.totalorder (!%p118_p3), %s1685_s12, 0 }
   0xe   : > { %s139_s19 = scalar_select %p138_p5, %s1689_s13, 1 }
   0xf   : > { %s141_s20 = scalar_select %p140_p6, %s1685_s12, 3 }
  0x10   : > { %s1587_s21 = smul.u32 24, %s139_s19 }
  0x11   : > { %s1586_s22 = smul.u32 6, %s141_s20 }
  0x12   : > { %150 = sbr.rel (%p1493_p7) target bundleno = 77 (0x4d), region = 32 }
  0x13   : > { %s144_s23 = sadd.s32 %s1587_s21, %s1586_s22  ;;  %s183_s28 = smul.u32 (!%p1493_p7), 192, %s1689_s13 }
  0x14   : > { %s1492_s24 = sshll.u32 %s144_s23, 3 }
  0x15   : > { %s1765_s27 = scalar_lea.vmem %s2220_s3, %s1492_s24  ;;  %s1772_s4 = scalar_lea.vmem (!%p1493_p7), %s2217_s0, %s183_s28 }
  0x17   : > { %v1703_v0 = vmov 0.0   ;;  %v200_v1 = vld [vmem:[%s1772_s4] sm:$0x3f]  ;;  %v202_v2 = vld [vmem:[%s1772_s4 + $0x8] sm:$0x3f] }
  0x18   : > { %152 = vst [vmem:[#allocation2 + $0x8] sm:$0xff] %v1703_v0  ;;  %v204_v3 = vld [vmem:[%s1772_s4 + $0x10] sm:$0x3f]  ;;  %v206_v4 = vld [vmem:[%s1772_s4 + $0x18] sm:$0x3f] }
  0x19   : > { %151 = vst [vmem:[#allocation2] sm:$0xff] %v1703_v0  ;;  %v208_v5 = vld [vmem:[%s1772_s4 + $0x20] sm:$0x3f]  ;;  %v210_v6 = vld [vmem:[%s1772_s4 + $0x28] sm:$0x3f] }
  0x1a   : > { %153 = vst [vmem:[#allocation2 + $0x10] sm:$0xff] %v1703_v0 }
  0x1b   : > { %154 = vst [vmem:[#allocation2 + $0x18] sm:$0xff] %v1703_v0 }
  0x1c   : > { %155 = vst [vmem:[#allocation2 + $0x20] sm:$0xff] %v1703_v0 }
  0x1d   : > { %156 = vst [vmem:[#allocation2 + $0x28] sm:$0xff] %v1703_v0 }
  0x1e   : > { %157 = vst [vmem:[#allocation2 + $0x30] sm:$0xff] %v1703_v0 }
  0x1f   : > { %158 = vst [vmem:[#allocation2 + $0x38] sm:$0xff] %v1703_v0 }
  0x20   : > { %159 = vst [vmem:[#allocation2 + $0x40] sm:$0xff] %v1703_v0 }
  0x21   : > { %160 = vst [vmem:[#allocation2 + $0x48] sm:$0xff] %v1703_v0 }
  0x22   : > { %161 = vst [vmem:[#allocation2 + $0x50] sm:$0xff] %v1703_v0 }
  0x23   : > { %162 = vst [vmem:[#allocation2 + $0x58] sm:$0xff] %v1703_v0 }
  0x24   : > { %163 = vst [vmem:[#allocation2 + $0x60] sm:$0xff] %v1703_v0 }
  0x25   : > { %164 = vst [vmem:[#allocation2 + $0x68] sm:$0xff] %v1703_v0 }
  0x26   : > { %165 = vst [vmem:[#allocation2 + $0x70] sm:$0xff] %v1703_v0 }
  0x27   : > { %166 = vst [vmem:[#allocation2 + $0x78] sm:$0xff] %v1703_v0 }
  0x28   : > { %167 = vst [vmem:[#allocation2 + $0x80] sm:$0xff] %v1703_v0 }
  0x29   : > { %168 = vst [vmem:[#allocation2 + $0x88] sm:$0xff] %v1703_v0 }
  0x2a   : > { %169 = vst [vmem:[#allocation2 + $0x90] sm:$0xff] %v1703_v0 }
  0x2b   : > { %170 = vst [vmem:[#allocation2 + $0x98] sm:$0xff] %v1703_v0 }
  0x2c   : > { %171 = vst [vmem:[#allocation2 + $0xa0] sm:$0xff] %v1703_v0 }
  0x2d   : > { %172 = vst [vmem:[#allocation2 + $0xa8] sm:$0xff] %v1703_v0 }
  0x2e   : > { %173 = vst [vmem:[#allocation2 + $0xb0] sm:$0xff] %v1703_v0 }
  0x2f   : > { %174 = vst [vmem:[#allocation2 + $0xb8] sm:$0xff] %v1703_v0 }
  0x30   : > { %175 = vst [vmem:[#allocation2 + $0xc0] sm:$0xff] %v1703_v0 }
  0x31   : > { %176 = vst [vmem:[#allocation2 + $0xc8] sm:$0xff] %v1703_v0 }
  0x32   : > { %177 = vst [vmem:[#allocation2 + $0xd0] sm:$0xff] %v1703_v0 }
  0x33   : > { %178 = vst [vmem:[#allocation2 + $0xd8] sm:$0xff] %v1703_v0 }
  0x34   : > { %179 = vst [vmem:[#allocation2 + $0xe0] sm:$0xff] %v1703_v0 }
  0x35   : > { %180 = vst [vmem:[#allocation2 + $0xe8] sm:$0xff] %v1703_v0 }
  0x36   : > { %181 = vst [vmem:[#allocation2 + $0xf0] sm:$0xff] %v1703_v0 }
  0x37   : > { %182 = vst [vmem:[#allocation2 + $0xf8] sm:$0xff] %v1703_v0 }
  0x38   : > { %201 = vst [vmem:[#allocation2 + $0x9] sm:$0x3f] %v200_v1 }
  0x39   : > { %203 = vst [vmem:[#allocation2 + $0x11] sm:$0x3f] %v202_v2 }
  0x3a   : > { %205 = vst [vmem:[#allocation2 + $0x19] sm:$0x3f] %v204_v3 }
  0x3b   : > { %207 = vst [vmem:[#allocation2 + $0x21] sm:$0x3f] %v206_v4 }
  0x3c   : > { %209 = vst [vmem:[#allocation2 + $0x29] sm:$0x3f] %v208_v5 }
  0x3d   : > { %211 = vst [vmem:[#allocation2 + $0x31] sm:$0x3f] %v210_v6 }
  0x3e   : > { %247 = vsyncadd [#allocation3], 576  ;;  %v264_v7 = vld [vmem:[%s1772_s4] sm:$0x3f]  ;;  %v266_v8 = vld [vmem:[%s1772_s4 + $0x8] sm:$0x3f] }
  0x3f   : > { %265 = vst [vmem:[#allocation2 + $0x49] sm:$0x3f] %v264_v7  ;;  %v268_v9 = vld [vmem:[%s1772_s4 + $0x10] sm:$0x3f]  ;;  %v270_v10 = vld [vmem:[%s1772_s4 + $0x18] sm:$0x3f] }
  0x40   : > { %267 = vst [vmem:[#allocation2 + $0x51] sm:$0x3f] %v266_v8  ;;  %v272_v11 = vld [vmem:[%s1772_s4 + $0x20] sm:$0x3f]  ;;  %v274_v12 = vld [vmem:[%s1772_s4 + $0x28] sm:$0x3f] }
  0x41   : > { %269 = vst [vmem:[#allocation2 + $0x59] sm:$0x3f] %v268_v9 }
  0x42   : > { %271 = vst [vmem:[#allocation2 + $0x61] sm:$0x3f] %v270_v10 }
  0x43   : > { %273 = vst [vmem:[#allocation2 + $0x69] sm:$0x3f] %v272_v11 }
  0x44   : > { %275 = vst [vmem:[#allocation2 + $0x71] sm:$0x3f] %v274_v12 }
  0x45   : > { %311 = vsyncadd [#allocation3 + $0x1], 576  ;;  %v1494_v13 = vld [vmem:[%s1772_s4 + $0x30] sm:$0x3f]  ;;  %v1495_v14 = vld [vmem:[%s1772_s4 + $0x38] sm:$0x3f] }
  0x46   : > { %331 = vst [vmem:[#allocation2 + $0x89] sm:$0x3f] %v1494_v13  ;;  %v1496_v15 = vld [vmem:[%s1772_s4 + $0x40] sm:$0x3f]  ;;  %v1497_v16 = vld [vmem:[%s1772_s4 + $0x48] sm:$0x3f] }
  0x47   : > { %333 = vst [vmem:[#allocation2 + $0x91] sm:$0x3f] %v1495_v14  ;;  %v1498_v17 = vld [vmem:[%s1772_s4 + $0x50] sm:$0x3f]  ;;  %v1499_v18 = vld [vmem:[%s1772_s4 + $0x58] sm:$0x3f] }
  0x48   : > { %335 = vst [vmem:[#allocation2 + $0x99] sm:$0x3f] %v1496_v15 }
  0x49   : > { %337 = vst [vmem:[#allocation2 + $0xa1] sm:$0x3f] %v1497_v16 }
  0x4a   : > { %339 = vst [vmem:[#allocation2 + $0xa9] sm:$0x3f] %v1498_v17 }
  0x4b   : > { %341 = vst [vmem:[#allocation2 + $0xb1] sm:$0x3f] %v1499_v18 }
  0x4c   : > { %377 = vsyncadd [#allocation3 + $0x2], 576 }
  0x4d PF: > { %s1793_s5 = sadd.s32 1, %s1685_s12 }
  0x4e   : > { %p379_p8 = scmp.lt.s32.totalorder %s1793_s5, 4  ;;  %p1500_p9 = scmp.ge.s32.totalorder %s1793_s5, 4 }
  0x4f   : > { %s383_s6 = sadd.s32 (!%p1500_p9), 3, %s1685_s12  ;;  %s396_s7 = sadd.s32 (!%p1500_p9), 2, %s1685_s12 }
  0x50   : > { %382 = sbr.rel (%p1500_p9) target bundleno = 100 (0x64), region = 147  ;;  %p384_p10 = scmp.lt.s32.totalorder (!%p1500_p9), %s383_s6, 0 }
  0x51   : > { %s385_s8 = ssub.s32 (!%p1500_p9), 0, %s383_s6  ;;  %p397_p11 = scmp.gt.s32.totalorder (!%p1500_p9), %s396_s7, 0 }
  0x52   : > { %s1501_s9 = smin.u32 (!%p1500_p9), %s385_s8, %s383_s6  ;;  %p1504_p12 = scmp.lt.s32.totalorder (!%p1500_p9), %s396_s7, 3 }
  0x53   : > { %s387_s10 = sand.u32 (!%p1500_p9), 3, %s1501_s9   ;;  %s402_s19 = smul.u32 (!%p1500_p9), 192, %s1689_s13 }
  0x54   : > { %s388_s11 = ssub.s32 (!%p1500_p9), 0, %s387_s10 }
  0x55   : > { %s2238_s11 = smov (!%p384_p10, %s388_s11), %s387_s10  ;;  %s2240_s7 = smov (!%p397_p11, %s396_s7), 0 }
  0x56   : > { %p1503_p13 = scmp.lt.s32.totalorder %s2238_s11, 0  ;;  %s394_s20 = sadd.s32 4, %s2238_s11 }
  0x57   : > { %s2242_s7 = smov (!%p1504_p12, %s2240_s7), 3 }
  0x58   : > { %s2244_s20 = smov (!%p1503_p13, %s394_s20), %s2238_s11  ;;  %s401_s21 = smul.u32 48, %s2242_s7 }
  0x59   : > { %s1509_s22 = sshll.u32 %s2244_s20, 6  ;;  %s408_s13 = scalar_lea.sflag [#allocation3], %s2244_s20 }
  0x5a   : > { %s403_s23 = sadd.s32 %s402_s19, %s401_s21  ;;  %s1409_s28 = scalar_lea.vmem [#allocation2], %s1509_s22 }
  0x5b   : > { %s404_s26 = scalar_lea.vmem %s2217_s0, %s403_s23 }
  0x5c   : > { %v423_v19 = vld [vmem:[%s404_s26] sm:$0x3f]  ;;  %v425_v20 = vld [vmem:[%s404_s26 + $0x8] sm:$0x3f]  ;;  %v427_v21 = vld [vmem:[%s404_s26 + $0x10] sm:$0x3f] }
  0x5d   : > { %1510 = vst [vmem:[%s1409_s28 + $0x9] sm:$0x3f] %v423_v19  ;;  %v429_v22 = vld [vmem:[%s404_s26 + $0x18] sm:$0x3f]  ;;  %v431_v23 = vld [vmem:[%s404_s26 + $0x20] sm:$0x3f] }
  0x5e   : > { %1511 = vst [vmem:[%s1409_s28 + $0x11] sm:$0x3f] %v425_v20  ;;  %v433_v24 = vld [vmem:[%s404_s26 + $0x28] sm:$0x3f] }
  0x5f   : > { %1512 = vst [vmem:[%s1409_s28 + $0x19] sm:$0x3f] %v427_v21 }
  0x60   : > { %1513 = vst [vmem:[%s1409_s28 + $0x21] sm:$0x3f] %v429_v22 }
  0x61   : > { %1514 = vst [vmem:[%s1409_s28 + $0x29] sm:$0x3f] %v431_v23 }
  0x62   : > { %1515 = vst [vmem:[%s1409_s28 + $0x31] sm:$0x3f] %v433_v24 }
  0x63   : > { %470 = vsyncadd %s408_s13, 576 }
  0x64 PF: > { %p1594_p0 = scmp.eq.s32.totalorder %s1685_s12, 0 }
  0x66   : > { %1668 = dma.done.wait (%p1594_p0), [#allocation3], 576 }
  0x67   : > { %1670 = vsyncadd (%p1594_p0), [#allocation3], 4294966720 }
  0x68   : > { %1672 = dma.done.wait (%p1594_p0), [#allocation3 + $0x1], 576 }
  0x69   : > { %1674 = vsyncadd (%p1594_p0), [#allocation3 + $0x1], 4294966720 }
  0x6a   : > { %1676 = dma.done.wait (%p1594_p0), [#allocation3 + $0x2], 576 }
  0x6b   : > { %1678 = vsyncadd (%p1594_p0), [#allocation3 + $0x2], 4294966720  ;;  %p1595_p1 = scmp.gt.s32.totalorder %s1685_s12, 0  ;;  %s488_s29 = sadd.s32 2, %s1685_s12 }
  0x6c   : > { %p489_p2 = scmp.lt.s32.totalorder %s488_s29, 0  ;;  %s490_s30 = ssub.s32 0, %s488_s29 }
  0x6d   : > { %s1518_s4 = smin.u32 %s490_s30, %s488_s29 }
  0x6e   : > { %s492_s6 = sand.u32 3, %s1518_s4  }
  0x6f   : > { %s493_s7 = ssub.s32 0, %s492_s6 }
  0x70   : > { %s2246_s7 = smov (!%p489_p2, %s493_s7), %s492_s6 }
  0x71   : > { %p1520_p3 = scmp.lt.s32.totalorder %s2246_s7, 0  ;;  %s499_s8 = sadd.s32 4, %s2246_s7 }
  0x73   : > { %s2248_s8 = smov (!%p1520_p3, %s499_s8), %s2246_s7 }
  0x74   : > { %s501_s9 = scalar_lea.sflag [#allocation3], %s2248_s8 }
  0x75   : > { %1680 = dma.done.wait (%p1595_p1), %s501_s9, 576 }
  0x76   : > { %1682 = vsyncadd (%p1595_p1), %s501_s9, 4294966720  ;;  %s512_s10 = sadd.s32 4294967295, %s1685_s12  ;;  %p522_p4 = scmp.ge.s32.totalorder %s1685_s12, 0  ;;  %v507_v28 = vld [vmem:[%s2218_s1 + $0x8] sm:$0x1] }
  0x77   : > { %p513_p5 = scmp.ge.s32.totalorder %s512_s10, 0  ;;  %p514_p6 = scmp.lt.s32.totalorder %s512_s10, 4  ;;  %v1837_v31 = vld [vmem:[%s2218_s1 + $0x18] sm:$0x1]  ;;  %v1842_v32 = vld [vmem:[%s2218_s1 + $0x28] sm:$0x1] }
  0x78   : > { %p523_p7 = scmp.lt.s32.totalorder %s1685_s12, 4  ;;  %p531_p10 = scmp.ge.s32.totalorder %s1793_s5, 0  ;;  %v1646_v40 = vld [vmem:[%s2219_s2] ss:$0 sm:$0xff] }
  0x79   : > { %p515_p9 = pnand %p514_p6, %p513_p5  ;;  %s544_s21 = ssub.s32 0, %s1685_s12 }
  0x7a   : > { %p524_p11 = pnand %p523_p7, %p522_p4  ;;  %p532_p12 = pnand %p531_p10, %p379_p8 }
  0x7b   : > { %s1521_s11 = scalar_select %p515_p9, 0, 1 }
  0x7c   : > { %s1815_s19 = scalar_select %p524_p11, 0, 1 }
  0x7d   : > { %p1637_p13 = scmp.eq.s32.totalorder %s1521_s11, 1  ;;  %p543_p0 = scmp.lt.s32.totalorder %s1685_s12, 0  ;;  %v518_v25 = vstv %s1521_s11 }
  0x7e   : > { %s1817_s20 = scalar_select %p532_p12, 0, 1  ;;  %v527_v26 = vstv %s1815_s19  ;;  %vm1827_vm0 = vcmp.eq.s32.totalorder %v518_v25, 1 }
  0x7f   : > { %s1524_s22 = smin.u32 %s1685_s12, %s544_s21  ;;  %vm1844_vm1 = vcmp.eq.s32.totalorder %v527_v26, 1  ;;  %v521_v35 = vsel %vm1827_vm0, %v507_v28, 0.0  ;;  %p804_p1 = scmp.lt.s32.totalorder %s1793_s5, 0 }
  0x80   : > { %s1638_s23 = scalar_select %p1637_p13, 255, 0  ;;  %v535_v27 = vstv %s1817_s20  ;;  %v530_v38 = vsel %vm1844_vm1, %v1837_v31, 0.0  ;;  %v1882_v50 = vperm.slane %v521_v35, 0 }
  0x81   : > { %s546_s24 = sand.u32 3, %s1524_s22   ;;  %vm1848_vm2 = vcmp.eq.s32.totalorder %v535_v27, 1  ;;  %s805_s22 = ssub.s32 0, %s1793_s5 }
  0x82   : > { %s547_s25 = ssub.s32 0, %s546_s24  ;;  %v1639_v30 = vld [vmem:[%s2218_s1] sm:%s1638_s23]  ;;  %v538_v39 = vsel %vm1848_vm2, %v1842_v32, 0.0  ;;  %s1906_s23 = smin.u32 %s805_s22, %s1793_s5 }
  0x83   : > { %s2250_s25 = smov (!%p543_p0, %s547_s25), %s546_s24  ;;  %v563_v36 = vperm.slane %v1639_v30, 0  ;;  %v576_v37 = vperm.slane %v1639_v30, 1  ;;  %v607_v41 = vperm.slane %v1639_v30, 2  ;;  %v1863_v42 = vperm.slane %v1639_v30, 3  ;;  %s807_s24 = sand.u32 3, %s1906_s23  }
  0x84   : > { %p1526_p8 = scmp.lt.s32.totalorder %s2250_s25, 0  ;;  %s553_s12 = sadd.s32 4, %s2250_s25  ;;  %v1865_v43 = vperm.slane %v1639_v30, 4  ;;  %v1867_v44 = vperm.slane %v1639_v30, 5  ;;  %v1878_v48 = vperm.slane %v1639_v30, 6  ;;  %v1880_v49 = vperm.slane %v1639_v30, 7 }
  0x85   : > { %p1640_p3 = scmp.eq.s32.totalorder %s1815_s19, 1  ;;  %p1643_p4 = scmp.eq.s32.totalorder %s1817_s20, 1 }
  0x86   : > { %s2252_s12 = smov (!%p1526_p8, %s553_s12), %s2250_s25  ;;  %s808_s25 = ssub.s32 0, %s807_s24 }
  0x87   : > { %s1527_s11 = sshll.u32 %s2252_s12, 6  ;;  %s2254_s25 = smov (!%p804_p1, %s808_s25), %s807_s24 }
  0x88   : > { %s1869_s21 = scalar_lea.vmem [#allocation2], %s1527_s11  ;;  %p1544_p2 = scmp.lt.s32.totalorder %s2254_s25, 0 }
  0x89   : > { %v557_v45 = vld [vmem:[%s1869_s21] sm:$0xff]  ;;  %v1873_v46 = vld [vmem:[%s1869_s21 + $0x8] sm:$0xff]  ;;  %v1876_v47 = vld [vmem:[%s1869_s21 + $0x10] sm:$0xff]  ;;  %s814_s5 = sadd.s32 4, %s2254_s25  ;;  %s1563_s20 = sshll.u32 %s2248_s8, 6 }
  0x8a   : > { %v1885_v51 = vld [vmem:[%s1869_s21 + $0x18] sm:$0xff]  ;;  %v1888_v52 = vld [vmem:[%s1869_s21 + $0x20] sm:$0xff]  ;;  %v1891_v53 = vld [vmem:[%s1869_s21 + $0x28] sm:$0xff]  ;;  %v564_v54 = vmul.f32 %v563_v36, %v557_v45  ;;  %v565_v55 = vmul.f32 %v563_v36, %v1873_v46  ;;  %v566_v56 = vmul.f32 %v563_v36, %v1876_v47  ;;  %v577_v57 = vmul.f32 %v576_v37, %v557_v45  ;;  %s2256_s5 = smov (!%p1544_p2, %s814_s5), %s2254_s25  ;;  %s2096_s8 = scalar_lea.vmem [#allocation2], %s1563_s20 }
  0x8b   : > { %v567_v58 = vmul.f32 %v563_v36, %v1885_v51  ;;  %v568_v59 = vmul.f32 %v563_v36, %v1888_v52  ;;  %v569_v60 = vmul.f32 %v563_v36, %v1891_v53  ;;  %v578_v61 = vmul.f32 %v576_v37, %v1873_v46  ;;  %v1914_v36 = vld [vmem:[%s1869_s21 + $0x30] sm:$0xff]  ;;  %s1545_s26 = sshll.u32 %s2256_s5, 6  ;;  %v1080_v31 = vld [vmem:[%s2096_s8] sm:$0xff]  ;;  %v2100_v33 = vld [vmem:[%s2096_s8 + $0x8] sm:$0xff] }
  0x8c   : > { %v570_v62 = vadd.f32 %v1646_v40, %v564_v54  ;;  %v571_v63 = vadd.f32 %v1646_v40, %v565_v55  ;;  %v572_v0 = vadd.f32 %v1646_v40, %v566_v56  ;;  %v579_v1 = vmul.f32 %v576_v37, %v1876_v47  ;;  %s1641_s28 = scalar_select %p1640_p3, 255, 0 }
  0x8d   : > { %v573_v2 = vadd.f32 %v1646_v40, %v567_v58  ;;  %v574_v3 = vadd.f32 %v1646_v40, %v568_v59  ;;  %v575_v4 = vadd.f32 %v1646_v40, %v569_v60  ;;  %v580_v5 = vmul.f32 %v576_v37, %v1885_v51  ;;  %s2007_s29 = scalar_lea.vmem [#allocation2], %s1545_s26 }
  0x8e   : > { %v581_v6 = vmul.f32 %v576_v37, %v1888_v52  ;;  %v582_v7 = vmul.f32 %v576_v37, %v1891_v53  ;;  %v589_v8 = vrot.slane %v577_v57, 1  ;;  %v590_v9 = vrot.slane %v578_v61, 1  ;;  %s1644_s12 = scalar_select %p1643_p4, 255, 0 }
  0x8f   : > { %v591_v10 = vrot.slane %v579_v1, 1  ;;  %v592_v11 = vrot.slane %v580_v5, 1  ;;  %v608_v12 = vmul.f32 %v607_v41, %v557_v45  ;;  %v609_v13 = vmul.f32 %v607_v41, %v1873_v46 }
  0x90   : > { %v593_v14 = vrot.slane %v581_v6, 1  ;;  %v594_v15 = vrot.slane %v582_v7, 1  ;;  %v601_v16 = vadd.f32 %v589_v8, %v570_v62  ;;  %v602_v17 = vadd.f32 %v590_v9, %v571_v63 }
  0x91   : > { %v603_v18 = vadd.f32 %v591_v10, %v572_v0  ;;  %v604_v19 = vadd.f32 %v592_v11, %v573_v2  ;;  %v610_v20 = vmul.f32 %v607_v41, %v1876_v47  ;;  %v611_v21 = vmul.f32 %v607_v41, %v1885_v51 }
  0x92   : > { %v605_v22 = vadd.f32 %v593_v14, %v574_v3  ;;  %v606_v23 = vadd.f32 %v594_v15, %v575_v4  ;;  %v612_v24 = vmul.f32 %v607_v41, %v1888_v52  ;;  %v613_v25 = vmul.f32 %v607_v41, %v1891_v53 }
  0x93   : > { %v620_v26 = vrot.slane %v608_v12, 2  ;;  %v621_v27 = vrot.slane %v609_v13, 2  ;;  %v622_v28 = vrot.slane %v610_v20, 2  ;;  %v623_v29 = vrot.slane %v611_v21, 2 }
  0x94   : > { %v624_v30 = vrot.slane %v612_v24, 2  ;;  %v625_v35 = vrot.slane %v613_v25, 2  ;;  %v647_v37 = vmul.f32 %v1863_v42, %v1873_v46  ;;  %v648_v40 = vmul.f32 %v1863_v42, %v1876_v47 }
  0x95   : > { %v632_v45 = vadd.f32 %v620_v26, %v601_v16  ;;  %v633_v54 = vadd.f32 %v621_v27, %v602_v17  ;;  %v634_v41 = vadd.f32 %v622_v28, %v603_v18  ;;  %v635_v55 = vadd.f32 %v623_v29, %v604_v19 }
  0x96   : > { %v636_v56 = vadd.f32 %v624_v30, %v605_v22  ;;  %v637_v57 = vadd.f32 %v625_v35, %v606_v23  ;;  %v649_v58 = vmul.f32 %v1863_v42, %v1885_v51  ;;  %v650_v59 = vmul.f32 %v1863_v42, %v1888_v52  ;;  %v1541_v35 = vld [vmem:[%s1869_s21 + $0x38] sm:$0xff] }
  0x97   : > { %v651_v60 = vmul.f32 %v1863_v42, %v1891_v53  ;;  %v652_v61 = vmul.f32 %v1914_v36, %v1863_v42  ;;  %v653_v62 = vadd.f32 %v647_v37, %v632_v45  ;;  %v654_v63 = vadd.f32 %v648_v40, %v633_v54 }
  0x98   : > { %v655_v0 = vadd.f32 %v649_v58, %v634_v41  ;;  %v656_v1 = vadd.f32 %v650_v59, %v635_v55  ;;  %v660_v2 = vmul.f32 %v1865_v43, %v1873_v46  ;;  %v661_v3 = vmul.f32 %v1865_v43, %v1876_v47 }
  0x99   : > { %v657_v4 = vadd.f32 %v651_v60, %v636_v56  ;;  %v658_v5 = vadd.f32 %v652_v61, %v637_v57  ;;  %v662_v6 = vmul.f32 %v1865_v43, %v1885_v51  ;;  %v663_v42 = vmul.f32 %v1865_v43, %v1888_v52 }
  0x9a   : > { %v664_v7 = vmul.f32 %v1865_v43, %v1891_v53  ;;  %v665_v8 = vmul.f32 %v1914_v36, %v1865_v43  ;;  %v672_v9 = vrot.slane %v660_v2, 1  ;;  %v673_v10 = vrot.slane %v661_v3, 1 }
  0x9b   : > { %v674_v11 = vrot.slane %v662_v6, 1  ;;  %v675_v12 = vrot.slane %v663_v42, 1  ;;  %v691_v13 = vmul.f32 %v1867_v44, %v1873_v46  ;;  %v692_v14 = vmul.f32 %v1867_v44, %v1876_v47 }
  0x9c   : > { %v676_v15 = vrot.slane %v664_v7, 1  ;;  %v677_v16 = vrot.slane %v665_v8, 1  ;;  %v684_v17 = vadd.f32 %v672_v9, %v653_v62  ;;  %v685_v18 = vadd.f32 %v673_v10, %v654_v63 }
  0x9d   : > { %v686_v19 = vadd.f32 %v674_v11, %v655_v0  ;;  %v687_v20 = vadd.f32 %v675_v12, %v656_v1  ;;  %v693_v43 = vmul.f32 %v1867_v44, %v1885_v51  ;;  %v694_v21 = vmul.f32 %v1867_v44, %v1888_v52 }
  0x9e   : > { %v688_v46 = vadd.f32 %v676_v15, %v657_v4  ;;  %v689_v22 = vadd.f32 %v677_v16, %v658_v5  ;;  %v695_v23 = vmul.f32 %v1867_v44, %v1891_v53  ;;  %v696_v24 = vmul.f32 %v1914_v36, %v1867_v44 }
  0x9f   : > { %v703_v25 = vrot.slane %v691_v13, 2  ;;  %v704_v26 = vrot.slane %v692_v14, 2  ;;  %v705_v27 = vrot.slane %v693_v43, 2  ;;  %v706_v28 = vrot.slane %v694_v21, 2 }
  0xa0   : > { %v707_v29 = vrot.slane %v695_v23, 2  ;;  %v708_v30 = vrot.slane %v696_v24, 2  ;;  %v730_v37 = vmul.f32 %v1878_v48, %v1876_v47  ;;  %v731_v40 = vmul.f32 %v1878_v48, %v1885_v51 }
  0xa1   : > { %v715_v45 = vadd.f32 %v703_v25, %v684_v17  ;;  %v716_v44 = vadd.f32 %v704_v26, %v685_v18  ;;  %v717_v54 = vadd.f32 %v705_v27, %v686_v19  ;;  %v718_v41 = vadd.f32 %v706_v28, %v687_v20  ;;  %v1998_v17 = vld [vmem:[%s2218_s1 + $0x10] sm:%s1641_s28]  ;;  %v2020_v27 = vld [vmem:[%s2007_s29 + $0x20] sm:$0xff]  ;;  %v2023_v28 = vld [vmem:[%s2007_s29 + $0x28] sm:$0xff] }
  0xa2   : > { %v719_v55 = vadd.f32 %v707_v29, %v688_v46  ;;  %v720_v56 = vadd.f32 %v708_v30, %v689_v22  ;;  %v732_v57 = vmul.f32 %v1878_v48, %v1888_v52  ;;  %v733_v58 = vmul.f32 %v1878_v48, %v1891_v53  ;;  %v818_v46 = vld [vmem:[%s2007_s29] sm:$0xff]  ;;  %v2014_v25 = vld [vmem:[%s2007_s29 + $0x10] sm:$0xff] }
  0xa3   : > { %v734_v59 = vmul.f32 %v1914_v36, %v1878_v48  ;;  %v735_v60 = vmul.f32 %v1541_v35, %v1878_v48  ;;  %v736_v61 = vadd.f32 %v730_v37, %v715_v45  ;;  %v737_v62 = vadd.f32 %v731_v40, %v716_v44 }
  0xa4   : > { %v738_v63 = vadd.f32 %v732_v57, %v717_v54  ;;  %v739_v0 = vadd.f32 %v733_v58, %v718_v41  ;;  %v743_v1 = vmul.f32 %v1880_v49, %v1876_v47  ;;  %v744_v2 = vmul.f32 %v1880_v49, %v1885_v51 }
  0xa5   : > { %v740_v3 = vadd.f32 %v734_v59, %v719_v55  ;;  %v741_v4 = vadd.f32 %v735_v60, %v720_v56  ;;  %v745_v5 = vmul.f32 %v1880_v49, %v1888_v52  ;;  %v746_v48 = vmul.f32 %v1880_v49, %v1891_v53 }
  0xa6   : > { %v747_v6 = vmul.f32 %v1914_v36, %v1880_v49  ;;  %v748_v42 = vmul.f32 %v1541_v35, %v1880_v49  ;;  %v755_v7 = vrot.slane %v743_v1, 1  ;;  %v756_v8 = vrot.slane %v744_v2, 1 }
  0xa7   : > { %v757_v9 = vrot.slane %v745_v5, 1  ;;  %v758_v10 = vrot.slane %v746_v48, 1  ;;  %v774_v11 = vmul.f32 %v1882_v50, %v1876_v47  ;;  %v775_v12 = vmul.f32 %v1882_v50, %v1885_v51 }
  0xa8   : > { %v759_v13 = vrot.slane %v747_v6, 1  ;;  %v760_v14 = vrot.slane %v748_v42, 1  ;;  %v767_v15 = vadd.f32 %v755_v7, %v736_v61  ;;  %v768_v16 = vadd.f32 %v756_v8, %v737_v62 }
  0xa9   : > { %v769_v49 = vadd.f32 %v757_v9, %v738_v63  ;;  %v770_v18 = vadd.f32 %v758_v10, %v739_v0  ;;  %v776_v19 = vmul.f32 %v1882_v50, %v1888_v52  ;;  %v777_v47 = vmul.f32 %v1882_v50, %v1891_v53  ;;  %v2011_v52 = vld [vmem:[%s2007_s29 + $0x8] sm:$0xff] }
  0xaa   : > { %v771_v20 = vadd.f32 %v759_v13, %v740_v3  ;;  %v772_v43 = vadd.f32 %v760_v14, %v741_v4  ;;  %v778_v51 = vmul.f32 %v1914_v36, %v1882_v50  ;;  %v779_v21 = vmul.f32 %v1541_v35, %v1882_v50  ;;  %v2017_v36 = vld [vmem:[%s2007_s29 + $0x18] sm:$0xff] }
  0xab   : > { %v786_v22 = vrot.slane %v774_v11, 2  ;;  %v787_v53 = vrot.slane %v775_v12, 2  ;;  %v788_v23 = vrot.slane %v776_v19, 2  ;;  %v789_v24 = vrot.slane %v777_v47, 2 }
  0xac   : > { %v790_v50 = vrot.slane %v778_v51, 2  ;;  %v791_v26 = vrot.slane %v779_v21, 2  ;;  %v824_v29 = vperm.slane %v1998_v17, 0  ;;  %v837_v30 = vperm.slane %v1998_v17, 1 }
  0xad   : > { %v798_v35 = vadd.f32 %v786_v22, %v767_v15  ;;  %v799_v37 = vadd.f32 %v787_v53, %v768_v16  ;;  %v800_v40 = vadd.f32 %v788_v23, %v769_v49  ;;  %v801_v45 = vadd.f32 %v789_v24, %v770_v18 }
  0xae   : > { %v802_v44 = vadd.f32 %v790_v50, %v771_v20  ;;  %v803_v54 = vadd.f32 %v791_v26, %v772_v43  ;;  %v825_v41 = vmul.f32 %v824_v29, %v818_v46  ;;  %v826_v55 = vmul.f32 %v824_v29, %v2011_v52 }
  0xaf   : > { %v827_v56 = vmul.f32 %v824_v29, %v2014_v25  ;;  %v828_v57 = vmul.f32 %v824_v29, %v2017_v36  ;;  %v829_v58 = vmul.f32 %v824_v29, %v2020_v27  ;;  %v830_v59 = vmul.f32 %v824_v29, %v2023_v28 }
  0xb0   : > { %v831_v60 = vadd.f32 %v825_v41, %v798_v35  ;;  %v832_v61 = vadd.f32 %v826_v55, %v799_v37  ;;  %v838_v62 = vmul.f32 %v837_v30, %v818_v46  ;;  %v839_v63 = vmul.f32 %v837_v30, %v2011_v52  ;;  %v2047_v35 = vld [vmem:[%s2007_s29 + $0x30] sm:$0xff] }
  0xb1   : > { %v833_v0 = vadd.f32 %v827_v56, %v800_v40  ;;  %v834_v1 = vadd.f32 %v828_v57, %v801_v45  ;;  %v835_v2 = vadd.f32 %v829_v58, %v802_v44  ;;  %v836_v3 = vadd.f32 %v830_v59, %v803_v54 }
  0xb2   : > { %v840_v4 = vmul.f32 %v837_v30, %v2014_v25  ;;  %v841_v5 = vmul.f32 %v837_v30, %v2017_v36  ;;  %v842_v48 = vmul.f32 %v837_v30, %v2020_v27  ;;  %v843_v6 = vmul.f32 %v837_v30, %v2023_v28 }
  0xb3   : > { %v850_v42 = vrot.slane %v838_v62, 1  ;;  %v851_v7 = vrot.slane %v839_v63, 1  ;;  %v868_v8 = vperm.slane %v1998_v17, 2  ;;  %v907_v9 = vperm.slane %v1998_v17, 3 }
  0xb4   : > { %v852_v10 = vrot.slane %v840_v4, 1  ;;  %v853_v11 = vrot.slane %v841_v5, 1  ;;  %v854_v12 = vrot.slane %v842_v48, 1  ;;  %v855_v13 = vrot.slane %v843_v6, 1 }
  0xb5   : > { %v862_v14 = vadd.f32 %v850_v42, %v831_v60  ;;  %v863_v15 = vadd.f32 %v851_v7, %v832_v61  ;;  %v869_v16 = vmul.f32 %v868_v8, %v818_v46  ;;  %v870_v49 = vmul.f32 %v868_v8, %v2011_v52 }
  0xb6   : > { %v864_v18 = vadd.f32 %v852_v10, %v833_v0  ;;  %v865_v19 = vadd.f32 %v853_v11, %v834_v1  ;;  %v866_v47 = vadd.f32 %v854_v12, %v835_v2  ;;  %v867_v20 = vadd.f32 %v855_v13, %v836_v3 }
  0xb7   : > { %v871_v43 = vmul.f32 %v868_v8, %v2014_v25  ;;  %v872_v51 = vmul.f32 %v868_v8, %v2017_v36  ;;  %v873_v21 = vmul.f32 %v868_v8, %v2020_v27  ;;  %v874_v22 = vmul.f32 %v868_v8, %v2023_v28 }
  0xb8   : > { %v881_v53 = vrot.slane %v869_v16, 2  ;;  %v882_v23 = vrot.slane %v870_v49, 2  ;;  %v908_v24 = vmul.f32 %v907_v9, %v2011_v52  ;;  %v909_v46 = vmul.f32 %v907_v9, %v2014_v25 }
  0xb9   : > { %v883_v50 = vrot.slane %v871_v43, 2  ;;  %v884_v26 = vrot.slane %v872_v51, 2  ;;  %v885_v29 = vrot.slane %v873_v21, 2  ;;  %v886_v30 = vrot.slane %v874_v22, 2 }
  0xba   : > { %v893_v37 = vadd.f32 %v881_v53, %v862_v14  ;;  %v894_v40 = vadd.f32 %v882_v23, %v863_v15  ;;  %v910_v45 = vmul.f32 %v907_v9, %v2017_v36  ;;  %v911_v44 = vmul.f32 %v907_v9, %v2020_v27 }
  0xbb   : > { %v895_v54 = vadd.f32 %v883_v50, %v864_v18  ;;  %v896_v41 = vadd.f32 %v884_v26, %v865_v19  ;;  %v897_v55 = vadd.f32 %v885_v29, %v866_v47  ;;  %v898_v56 = vadd.f32 %v886_v30, %v867_v20  ;;  %v1559_v26 = vld [vmem:[%s2007_s29 + $0x38] sm:$0xff] }
  0xbc   : > { %v912_v57 = vmul.f32 %v907_v9, %v2023_v28  ;;  %v913_v58 = vmul.f32 %v2047_v35, %v907_v9  ;;  %v914_v59 = vadd.f32 %v908_v24, %v893_v37  ;;  %v915_v60 = vadd.f32 %v909_v46, %v894_v40 }
  0xbd   : > { %v916_v61 = vadd.f32 %v910_v45, %v895_v54  ;;  %v917_v62 = vadd.f32 %v911_v44, %v896_v41  ;;  %v920_v63 = vperm.slane %v1998_v17, 4  ;;  %v951_v0 = vperm.slane %v1998_v17, 5 }
  0xbe   : > { %v918_v1 = vadd.f32 %v912_v57, %v897_v55  ;;  %v919_v2 = vadd.f32 %v913_v58, %v898_v56  ;;  %v990_v3 = vperm.slane %v1998_v17, 6  ;;  %v1003_v4 = vperm.slane %v1998_v17, 7 }
  0xbf   : > { %v921_v5 = vmul.f32 %v920_v63, %v2011_v52  ;;  %v922_v48 = vmul.f32 %v920_v63, %v2014_v25  ;;  %v923_v6 = vmul.f32 %v920_v63, %v2017_v36  ;;  %v924_v42 = vmul.f32 %v920_v63, %v2020_v27 }
  0xc0   : > { %v925_v7 = vmul.f32 %v920_v63, %v2023_v28  ;;  %v926_v8 = vmul.f32 %v2047_v35, %v920_v63  ;;  %v952_v9 = vmul.f32 %v951_v0, %v2011_v52  ;;  %v953_v10 = vmul.f32 %v951_v0, %v2014_v25 }
  0xc1   : > { %v933_v11 = vrot.slane %v921_v5, 1  ;;  %v934_v12 = vrot.slane %v922_v48, 1  ;;  %v935_v13 = vrot.slane %v923_v6, 1  ;;  %v936_v17 = vrot.slane %v924_v42, 1 }
  0xc2   : > { %v937_v14 = vrot.slane %v925_v7, 1  ;;  %v938_v15 = vrot.slane %v926_v8, 1  ;;  %v954_v16 = vmul.f32 %v951_v0, %v2017_v36  ;;  %v955_v49 = vmul.f32 %v951_v0, %v2020_v27 }
  0xc3   : > { %v945_v18 = vadd.f32 %v933_v11, %v914_v59  ;;  %v946_v19 = vadd.f32 %v934_v12, %v915_v60  ;;  %v947_v47 = vadd.f32 %v935_v13, %v916_v61  ;;  %v948_v20 = vadd.f32 %v936_v17, %v917_v62  ;;  %v2082_v61 = vld [vmem:[%s2218_s1 + $0x20] sm:%s1644_s12] }
  0xc4   : > { %v949_v52 = vadd.f32 %v937_v14, %v918_v1  ;;  %v950_v43 = vadd.f32 %v938_v15, %v919_v2  ;;  %v956_v51 = vmul.f32 %v951_v0, %v2023_v28  ;;  %v957_v21 = vmul.f32 %v2047_v35, %v951_v0 }
  0xc5   : > { %v964_v22 = vrot.slane %v952_v9, 2  ;;  %v965_v53 = vrot.slane %v953_v10, 2  ;;  %v966_v23 = vrot.slane %v954_v16, 2  ;;  %v967_v24 = vrot.slane %v955_v49, 2 }
  0xc6   : > { %v968_v46 = vrot.slane %v956_v51, 2  ;;  %v969_v50 = vrot.slane %v957_v21, 2  ;;  %v991_v29 = vmul.f32 %v990_v3, %v2014_v25  ;;  %v992_v30 = vmul.f32 %v990_v3, %v2017_v36  ;;  %v2106_v51 = vld [vmem:[%s2096_s8 + $0x10] sm:$0xff]  ;;  %v2109_v21 = vld [vmem:[%s2096_s8 + $0x18] sm:$0xff] }
  0xc7   : > { %v976_v37 = vadd.f32 %v964_v22, %v945_v18  ;;  %v977_v40 = vadd.f32 %v965_v53, %v946_v19  ;;  %v978_v45 = vadd.f32 %v966_v23, %v947_v47  ;;  %v979_v44 = vadd.f32 %v967_v24, %v948_v20  ;;  %v2112_v23 = vld [vmem:[%s2096_s8 + $0x20] sm:$0xff]  ;;  %v2115_v24 = vld [vmem:[%s2096_s8 + $0x28] sm:$0xff] }
  0xc8   : > { %v980_v54 = vadd.f32 %v968_v46, %v949_v52  ;;  %v981_v41 = vadd.f32 %v969_v50, %v950_v43  ;;  %v993_v55 = vmul.f32 %v990_v3, %v2020_v27  ;;  %v994_v56 = vmul.f32 %v990_v3, %v2023_v28 }
  0xc9   : > { %v995_v57 = vmul.f32 %v2047_v35, %v990_v3  ;;  %v996_v58 = vmul.f32 %v1559_v26, %v990_v3  ;;  %v997_v59 = vadd.f32 %v991_v29, %v976_v37  ;;  %v998_v60 = vadd.f32 %v992_v30, %v977_v40 }
  0xca   : > { %v999_v62 = vadd.f32 %v993_v55, %v978_v45  ;;  %v1000_v63 = vadd.f32 %v994_v56, %v979_v44  ;;  %v1004_v0 = vmul.f32 %v1003_v4, %v2014_v25  ;;  %v1005_v1 = vmul.f32 %v1003_v4, %v2017_v36 }
  0xcb   : > { %v1001_v2 = vadd.f32 %v995_v57, %v980_v54  ;;  %v1002_v5 = vadd.f32 %v996_v58, %v981_v41  ;;  %v1006_v48 = vmul.f32 %v1003_v4, %v2020_v27  ;;  %v1007_v3 = vmul.f32 %v1003_v4, %v2023_v28 }
  0xcc   : > { %v1008_v6 = vmul.f32 %v2047_v35, %v1003_v4  ;;  %v1009_v42 = vmul.f32 %v1559_v26, %v1003_v4  ;;  %v1016_v7 = vrot.slane %v1004_v0, 1  ;;  %v1017_v8 = vrot.slane %v1005_v1, 1 }
  0xcd   : > { %v1018_v9 = vrot.slane %v1006_v48, 1  ;;  %v1019_v10 = vrot.slane %v1007_v3, 1  ;;  %v1034_v11 = vperm.slane %v530_v38, 0  ;;  %v1086_v12 = vperm.slane %v2082_v61, 0 }
  0xce   : > { %v1020_v13 = vrot.slane %v1008_v6, 1  ;;  %v1021_v17 = vrot.slane %v1009_v42, 1  ;;  %v1028_v14 = vadd.f32 %v1016_v7, %v997_v59  ;;  %v1029_v15 = vadd.f32 %v1017_v8, %v998_v60 }
  0xcf   : > { %v1030_v16 = vadd.f32 %v1018_v9, %v999_v62  ;;  %v1031_v49 = vadd.f32 %v1019_v10, %v1000_v63  ;;  %v1035_v18 = vmul.f32 %v1034_v11, %v2014_v25  ;;  %v1036_v4 = vmul.f32 %v1034_v11, %v2017_v36 }
  0xd0   : > { %v1032_v38 = vadd.f32 %v1020_v13, %v1001_v2  ;;  %v1033_v19 = vadd.f32 %v1021_v17, %v1002_v5  ;;  %v1037_v47 = vmul.f32 %v1034_v11, %v2020_v27  ;;  %v1038_v20 = vmul.f32 %v1034_v11, %v2023_v28 }
  0xd1   : > { %v1039_v25 = vmul.f32 %v2047_v35, %v1034_v11  ;;  %v1040_v36 = vmul.f32 %v1559_v26, %v1034_v11  ;;  %v1047_v52 = vrot.slane %v1035_v18, 2  ;;  %v1048_v43 = vrot.slane %v1036_v4, 2 }
  0xd2   : > { %v1049_v22 = vrot.slane %v1037_v47, 2  ;;  %v1050_v53 = vrot.slane %v1038_v20, 2  ;;  %v1087_v46 = vmul.f32 %v1086_v12, %v1080_v31  ;;  %v1088_v27 = vmul.f32 %v1086_v12, %v2100_v33 }
  0xd3   : > { %v1051_v50 = vrot.slane %v1039_v25, 2  ;;  %v1052_v28 = vrot.slane %v1040_v36, 2  ;;  %v1059_v29 = vadd.f32 %v1047_v52, %v1028_v14  ;;  %v1060_v35 = vadd.f32 %v1048_v43, %v1029_v15 }
  0xd4   : > { %v1061_v26 = vadd.f32 %v1049_v22, %v1030_v16  ;;  %v1062_v30 = vadd.f32 %v1050_v53, %v1031_v49  ;;  %v1089_v37 = vmul.f32 %v1086_v12, %v2106_v51  ;;  %v1090_v40 = vmul.f32 %v1086_v12, %v2109_v21 }
  0xd5   : > { %v1063_v45 = vadd.f32 %v1051_v50, %v1032_v38  ;;  %v1064_v44 = vadd.f32 %v1052_v28, %v1033_v19  ;;  %v1091_v54 = vmul.f32 %v1086_v12, %v2112_v23  ;;  %v1092_v41 = vmul.f32 %v1086_v12, %v2115_v24 }
  0xd6   : > { %v1093_v55 = vadd.f32 %v1087_v46, %v1059_v29  ;;  %v1094_v56 = vadd.f32 %v1088_v27, %v1060_v35  ;;  %v1095_v57 = vadd.f32 %v1089_v37, %v1061_v26  ;;  %v1096_v58 = vadd.f32 %v1090_v40, %v1062_v30  ;;  %v2143_v27 = vld [vmem:[%s2096_s8 + $0x30] sm:$0xff] }
  0xd7   : > { %v1097_v59 = vadd.f32 %v1091_v54, %v1063_v45  ;;  %v1098_v60 = vadd.f32 %v1092_v41, %v1064_v44  ;;  %v1099_v62 = vperm.slane %v2082_v61, 1  ;;  %v1130_v63 = vperm.slane %v2082_v61, 2 }
  0xd8   : > { %v1169_v0 = vperm.slane %v2082_v61, 3  ;;  %v1182_v1 = vperm.slane %v2082_v61, 4  ;;  %v2127_v2 = vperm.slane %v2082_v61, 5  ;;  %v2130_v5 = vperm.slane %v2082_v61, 6 }
  0xd9   : > { %v1100_v48 = vmul.f32 %v1099_v62, %v1080_v31  ;;  %v1101_v3 = vmul.f32 %v1099_v62, %v2100_v33  ;;  %v1102_v6 = vmul.f32 %v1099_v62, %v2106_v51  ;;  %v1103_v42 = vmul.f32 %v1099_v62, %v2109_v21 }
  0xda   : > { %v1104_v7 = vmul.f32 %v1099_v62, %v2112_v23  ;;  %v1105_v8 = vmul.f32 %v1099_v62, %v2115_v24  ;;  %v1131_v9 = vmul.f32 %v1130_v63, %v1080_v31  ;;  %v1132_v10 = vmul.f32 %v1130_v63, %v2100_v33 }
  0xdb   : > { %v1112_v11 = vrot.slane %v1100_v48, 1  ;;  %v1113_v12 = vrot.slane %v1101_v3, 1  ;;  %v1114_v13 = vrot.slane %v1102_v6, 1  ;;  %v1115_v17 = vrot.slane %v1103_v42, 1 }
  0xdc   : > { %v1116_v14 = vrot.slane %v1104_v7, 1  ;;  %v1117_v15 = vrot.slane %v1105_v8, 1  ;;  %v1133_v16 = vmul.f32 %v1130_v63, %v2106_v51  ;;  %v1134_v49 = vmul.f32 %v1130_v63, %v2109_v21 }
  0xdd   : > { %v1124_v18 = vadd.f32 %v1112_v11, %v1093_v55  ;;  %v1125_v4 = vadd.f32 %v1113_v12, %v1094_v56  ;;  %v1126_v38 = vadd.f32 %v1114_v13, %v1095_v57  ;;  %v1127_v19 = vadd.f32 %v1115_v17, %v1096_v58 }
  0xde   : > { %v1128_v47 = vadd.f32 %v1116_v14, %v1097_v59  ;;  %v1129_v20 = vadd.f32 %v1117_v15, %v1098_v60  ;;  %v1135_v31 = vmul.f32 %v1130_v63, %v2112_v23  ;;  %v1136_v25 = vmul.f32 %v1130_v63, %v2115_v24 }
  0xdf   : > { %v1143_v36 = vrot.slane %v1131_v9, 2  ;;  %v1144_v52 = vrot.slane %v1132_v10, 2  ;;  %v1145_v43 = vrot.slane %v1133_v16, 2  ;;  %v1146_v22 = vrot.slane %v1134_v49, 2 }
  0xe0   : > { %v1147_v53 = vrot.slane %v1135_v31, 2  ;;  %v1148_v46 = vrot.slane %v1136_v25, 2  ;;  %v1170_v50 = vmul.f32 %v1169_v0, %v2100_v33  ;;  %v1171_v28 = vmul.f32 %v1169_v0, %v2106_v51 }
  0xe1   : > { %v1155_v29 = vadd.f32 %v1143_v36, %v1124_v18  ;;  %v1156_v35 = vadd.f32 %v1144_v52, %v1125_v4  ;;  %v1157_v26 = vadd.f32 %v1145_v43, %v1126_v38  ;;  %v1158_v30 = vadd.f32 %v1146_v22, %v1127_v19  ;;  %v1577_v52 = vld [vmem:[%s2096_s8 + $0x38] sm:$0xff] }
  0xe2   : > { %v1159_v37 = vadd.f32 %v1147_v53, %v1128_v47  ;;  %v1160_v40 = vadd.f32 %v1148_v46, %v1129_v20  ;;  %v1172_v45 = vmul.f32 %v1169_v0, %v2109_v21  ;;  %v1173_v44 = vmul.f32 %v1169_v0, %v2112_v23 }
  0xe3   : > { %v1174_v54 = vmul.f32 %v1169_v0, %v2115_v24  ;;  %v1175_v41 = vmul.f32 %v2143_v27, %v1169_v0  ;;  %v1176_v55 = vadd.f32 %v1170_v50, %v1155_v29  ;;  %v1177_v56 = vadd.f32 %v1171_v28, %v1156_v35 }
  0xe4   : > { %v1178_v57 = vadd.f32 %v1172_v45, %v1157_v26  ;;  %v1179_v58 = vadd.f32 %v1173_v44, %v1158_v30  ;;  %v1183_v59 = vmul.f32 %v1182_v1, %v2100_v33  ;;  %v1184_v60 = vmul.f32 %v1182_v1, %v2106_v51 }
  0xe5   : > { %v1180_v62 = vadd.f32 %v1174_v54, %v1159_v37  ;;  %v1181_v63 = vadd.f32 %v1175_v41, %v1160_v40  ;;  %v1185_v48 = vmul.f32 %v1182_v1, %v2109_v21  ;;  %v1186_v3 = vmul.f32 %v1182_v1, %v2112_v23 }
  0xe6   : > { %v1187_v6 = vmul.f32 %v1182_v1, %v2115_v24  ;;  %v1188_v42 = vmul.f32 %v2143_v27, %v1182_v1  ;;  %v1195_v7 = vrot.slane %v1183_v59, 1  ;;  %v1196_v0 = vrot.slane %v1184_v60, 1 }
  0xe7   : > { %v1197_v8 = vrot.slane %v1185_v48, 1  ;;  %v1198_v9 = vrot.slane %v1186_v3, 1  ;;  %v1214_v10 = vmul.f32 %v2127_v2, %v2100_v33  ;;  %v1215_v11 = vmul.f32 %v2127_v2, %v2106_v51 }
  0xe8   : > { %v1199_v12 = vrot.slane %v1187_v6, 1  ;;  %v1200_v13 = vrot.slane %v1188_v42, 1  ;;  %v1207_v17 = vadd.f32 %v1195_v7, %v1176_v55  ;;  %v1208_v14 = vadd.f32 %v1196_v0, %v1177_v56 }
  0xe9   : > { %v1209_v15 = vadd.f32 %v1197_v8, %v1178_v57  ;;  %v1210_v16 = vadd.f32 %v1198_v9, %v1179_v58  ;;  %v1216_v1 = vmul.f32 %v2127_v2, %v2109_v21  ;;  %v1217_v49 = vmul.f32 %v2127_v2, %v2112_v23 }
  0xea   : > { %v1211_v18 = vadd.f32 %v1199_v12, %v1180_v62  ;;  %v1212_v4 = vadd.f32 %v1200_v13, %v1181_v63  ;;  %v1218_v33 = vmul.f32 %v2127_v2, %v2115_v24  ;;  %v1219_v38 = vmul.f32 %v2143_v27, %v2127_v2 }
  0xeb   : > { %v1226_v19 = vrot.slane %v1214_v10, 2  ;;  %v1227_v47 = vrot.slane %v1215_v11, 2  ;;  %v1228_v20 = vrot.slane %v1216_v1, 2  ;;  %v1229_v31 = vrot.slane %v1217_v49, 2 }
  0xec   : > { %v1230_v25 = vrot.slane %v1218_v33, 2  ;;  %v1231_v36 = vrot.slane %v1219_v38, 2  ;;  %v1253_v43 = vmul.f32 %v2130_v5, %v2106_v51  ;;  %v1254_v22 = vmul.f32 %v2130_v5, %v2109_v21 }
  0xed   : > { %v1238_v53 = vadd.f32 %v1226_v19, %v1207_v17  ;;  %v1239_v46 = vadd.f32 %v1227_v47, %v1208_v14  ;;  %v1240_v50 = vadd.f32 %v1228_v20, %v1209_v15  ;;  %v1241_v28 = vadd.f32 %v1229_v31, %v1210_v16 }
  0xee   : > { %v1242_v29 = vadd.f32 %v1230_v25, %v1211_v18  ;;  %v1243_v35 = vadd.f32 %v1231_v36, %v1212_v4  ;;  %v1255_v2 = vmul.f32 %v2130_v5, %v2112_v23  ;;  %v1256_v26 = vmul.f32 %v2130_v5, %v2115_v24 }
  0xef   : > { %v1257_v30 = vmul.f32 %v2143_v27, %v2130_v5  ;;  %v1258_v37 = vmul.f32 %v1577_v52, %v2130_v5  ;;  %v1259_v40 = vadd.f32 %v1253_v43, %v1238_v53  ;;  %v1260_v45 = vadd.f32 %v1254_v22, %v1239_v46 }
  0xf0   : > { %v1265_v44 = vperm.slane %v2082_v61, 7  ;;  %v1296_v54 = vperm.slane %v538_v39, 0  ;;  %v1261_v41 = vadd.f32 %v1255_v2, %v1240_v50  ;;  %v1262_v55 = vadd.f32 %v1256_v26, %v1241_v28 }
  0xf1   : > { %v1263_v56 = vadd.f32 %v1257_v30, %v1242_v29  ;;  %v1264_v57 = vadd.f32 %v1258_v37, %v1243_v35 }
  0xf2   : > { %v1266_v58 = vmul.f32 %v1265_v44, %v2106_v51  ;;  %v1267_v59 = vmul.f32 %v1265_v44, %v2109_v21  ;;  %v1268_v60 = vmul.f32 %v1265_v44, %v2112_v23  ;;  %v1269_v5 = vmul.f32 %v1265_v44, %v2115_v24 }
  0xf3   : > { %v1270_v62 = vmul.f32 %v2143_v27, %v1265_v44  ;;  %v1271_v61 = vmul.f32 %v1577_v52, %v1265_v44  ;;  %v1297_v34 = vmul.f32 %v1296_v54, %v2106_v51  ;;  %v1298_v32 = vmul.f32 %v1296_v54, %v2109_v21 }
  0xf4   : > { %v1278_v39 = vrot.slane %v1266_v58, 1  ;;  %v1279_v63 = vrot.slane %v1267_v59, 1  ;;  %v1280_v48 = vrot.slane %v1268_v60, 1  ;;  %v1281_v3 = vrot.slane %v1269_v5, 1 }
  0xf5   : > { %v1282_v6 = vrot.slane %v1270_v62, 1  ;;  %v1283_v42 = vrot.slane %v1271_v61, 1  ;;  %v1299_v7 = vmul.f32 %v1296_v54, %v2112_v23  ;;  %v1300_v0 = vmul.f32 %v1296_v54, %v2115_v24 }
  0xf6   : > { %v1290_v8 = vadd.f32 %v1278_v39, %v1259_v40  ;;  %v1291_v9 = vadd.f32 %v1279_v63, %v1260_v45  ;;  %v1292_v10 = vadd.f32 %v1280_v48, %v1261_v41  ;;  %v1293_v11 = vadd.f32 %v1281_v3, %v1262_v55 }
  0xf7   : > { %v1294_v12 = vadd.f32 %v1282_v6, %v1263_v56  ;;  %v1301_v51 = vmul.f32 %v2143_v27, %v1296_v54  ;;  %v1302_v21 = vmul.f32 %v1577_v52, %v1296_v54  ;;  %v1309_v13 = vrot.slane %v1297_v34, 2 }
  0xf8   : > { %v1310_v17 = vrot.slane %v1298_v32, 2  ;;  %v1311_v14 = vrot.slane %v1299_v7, 2  ;;  %v1312_v23 = vrot.slane %v1300_v0, 2  ;;  %v1295_v15 = vadd.f32 %v1283_v42, %v1264_v57 }
  0xf9   : > { %v1313_v24 = vrot.slane %v1301_v51, 2  ;;  %v1314_v16 = vrot.slane %v1302_v21, 2  ;;  %v1321_v1 = vadd.f32 %v1309_v13, %v1290_v8 }
  0xfa   : > { %v1322_v49 = vadd.f32 %v1310_v17, %v1291_v9  ;;  %v1323_v18 = vadd.f32 %v1311_v14, %v1292_v10  ;;  %v1324_v4 = vadd.f32 %v1312_v23, %v1293_v11 }
  0xfb   : > { %v1325_v33 = vadd.f32 %v1313_v24, %v1294_v12  ;;  %1327 = vst [vmem:[%s1765_s27] sm:$0x3f] %v1321_v1  ;;  %v1326_v27 = vadd.f32 %v1314_v16, %v1295_v15 }
  0xfc   : > { %1328 = vst [vmem:[%s1765_s27 + $0x8] sm:$0x3f] %v1322_v49 }
  0xfd   : > { %1329 = vst [vmem:[%s1765_s27 + $0x10] sm:$0x3f] %v1323_v18 }
  0xfe   : > { %1330 = vst [vmem:[%s1765_s27 + $0x18] sm:$0x3f] %v1324_v4 }
  0xff   : > { %1331 = vst [vmem:[%s1765_s27 + $0x20] sm:$0x3f] %v1325_v33 }
 0x100   : > { %1332 = vst [vmem:[%s1765_s27 + $0x28] sm:$0x3f] %v1326_v27 }
 0x101 PF: > { %s13_s16 = sadd.s32 1, %s1701_s16   ;;  %s2227_s12 = smov %s1693_s14 }
 0x102   : > { %p10_p5 = scmp.ge.s32.totalorder %s13_s16, 10   ;;  %s2228_s13 = smov %s1697_s15 }
 0x103   : > { %s2229_s14 = smov %s2232_s17  ;;  %s2230_s15 = smov %s2236_s18 }
 0x104   :  { %12 = sbr.rel (!%p10_p5) target bundleno = 3 (0x3), region = 260 }
 0x109   :  { %1362 = vsyncmov [#allocation3] }
 0x10c   :  { %s1363_s27 = vpop.sfrf %1362 }
 0x10d   :  { %p1580_p6 = scmp.ne.s32.totalorder %s1363_s27, 0 }
 0x10f   :  { %1367 = shalt.err (%p1580_p6)  }
 0x110   :  { %1369 = vsyncmov [#allocation3 + $0x1] }
 0x113   :  { %s1370_s6 = vpop.sfrf %1369 }
 0x114   :  { %p1581_p7 = scmp.ne.s32.totalorder %s1370_s6, 0 }
 0x116   :  { %1374 = shalt.err (%p1581_p7)  }
 0x117   :  { %1376 = vsyncmov [#allocation3 + $0x2] }
 0x11a   :  { %s1377_s7 = vpop.sfrf %1376 }
 0x11b   :  { %p1582_p9 = scmp.ne.s32.totalorder %s1377_s7, 0 }
 0x11d   :  { %1381 = shalt.err (%p1582_p9)  }
 0x11e   :  { %1383 = vsyncmov [#allocation3 + $0x3] }
 0x121   :  { %s1384_s9 = vpop.sfrf %1383 }
 0x122   :  { %p1583_p10 = scmp.ne.s32.totalorder %s1384_s9, 0 }
 0x124   :  { %1388 = shalt.err (%p1583_p10)  }

</bundles_post_ra>
